<compile_context>
chip_gen: v7x
topology: tpu7x:2x2x1
jax: 0.10.0
libtpu: 0.0.40
codegen_flags: <defaults>
</compile_context>

<pallas_src>
import functools

import jax
import jax.numpy as jnp
from jax import lax
from jax.experimental import pallas as pl
from jax.experimental.pallas import tpu as pltpu

_VMEM_LIMIT = 32 * 1024 * 1024  # safe scoped-VMEM budget on v5e/v6e/v7x


# ---------------- fused qkv 1x1 conv + 3x3 depthwise conv (per batch) ----------------

def _qkv_dwconv_kernel(x_ref, wq_ref, wd_ref, o_ref, pad_ref, *, H, W, C, C3):
    """Fused: qkv = dwconv3x3(x @ Wqkv).  No bias on either conv (as in module)."""
    x = x_ref[0]                                   # [H, W, C]

    # 1x1 conv as per-input-channel broadcast-FMA (C is tiny; avoids a
    # (H,W,C)->(H*W,C) relayout and a 4-deep MXU contraction).
    qkv = x[:, :, 0:1] * wq_ref[0]                 # (H,W,1)*(1,3C) -> (H,W,3C)
    for c in range(1, C):
        qkv = qkv + x[:, :, c:c + 1] * wq_ref[c]

    # Stage the zero-padded halo in VMEM scratch (no HBM jnp.pad intermediate).
    pad_ref[...] = jnp.zeros(pad_ref.shape, jnp.float32)
    pad_ref[1:H + 1, 1:W + 1, :] = qkv

    # Depthwise 3x3, stride 1, padding 1: nine shifted reads + VPU multiply-add.
    acc = jnp.zeros((H, W, C3), jnp.float32)
    for ki in range(3):
        for kj in range(3):
            acc = acc + pad_ref[ki:ki + H, kj:kj + W, :] * wd_ref[ki, kj]
    o_ref[0] = acc


def qkv_dwconv(x_nhwc, w_qkv, w_dw):
    """x: [B,H,W,C], w_qkv: [C,3C], w_dw: [3,3,3C] -> [B,H,W,3C]."""
    B, H, W, C = x_nhwc.shape
    C3 = w_qkv.shape[-1]
    kern = functools.partial(_qkv_dwconv_kernel, H=H, W=W, C=C, C3=C3)
    # TODO(synk): for large H*W additionally tile rows with a 1-row halo.
    return pl.pallas_call(
        kern,
        grid=(B,),
        in_specs=[
            pl.BlockSpec((1, H, W, C), lambda b: (b, 0, 0, 0)),
            # weights: constant index_map -> stay resident, no per-step re-DMA
            pl.BlockSpec((C, 1, C3), lambda b: (0, 0, 0)),
            pl.BlockSpec((3, 3, 1, C3), lambda b: (0, 0, 0, 0)),
        ],
        out_specs=pl.BlockSpec((1, H, W, C3), lambda b: (b, 0, 0, 0)),
        out_shape=jax.ShapeDtypeStruct((B, H, W, C3), jnp.float32),
        scratch_shapes=[pltpu.VMEM((H + 2, W + 2, C3), jnp.float32)],
        compiler_params=pltpu.CompilerParams(
            dimension_semantics=("parallel",),
            vmem_limit_bytes=_VMEM_LIMIT),
    )(x_nhwc, w_qkv.reshape(C, 1, C3), w_dw.reshape(3, 3, 1, C3))


# ------------------------------ window attention ------------------------------

def _window_attention_kernel(q_ref, k_ref, v_ref, pos_ref, o_ref, *, scale):
    q = q_ref[0, 0] * scale                        # [N, d]
    k = k_ref[0, 0]
    v = v_ref[0, 0]
    # q @ k^T on the MXU, f32 accumulation
    sim = lax.dot_general(q, k, (((1,), (1,)), ((), ())),
                          preferred_element_type=jnp.float32)
    sim = sim + pos_ref[0, 0]                      # [N, N]
    m = jnp.max(sim, axis=-1, keepdims=True)
    e = jnp.exp(sim - m)
    inv = pl.reciprocal(jnp.sum(e, axis=-1, keepdims=True), approx=True)  # EUP
    attn = e * inv
    o_ref[0, 0] = jnp.dot(attn, v, preferred_element_type=jnp.float32)


def window_attention(q, k, v, pos_emb, scale):
    """q,k,v: [B,heads,N,d]  pos_emb: [1,heads,N,N]  -> [B,heads,N,d]."""
    B, nh, N, d = q.shape
    kern = functools.partial(_window_attention_kernel, scale=scale)
    tok_spec = pl.BlockSpec((1, 1, N, d), lambda b, h: (b, h, 0, 0))
    return pl.pallas_call(
        kern,
        grid=(B, nh),
        in_specs=[tok_spec, tok_spec, tok_spec,
                  pl.BlockSpec((1, 1, N, N), lambda b, h: (0, h, 0, 0))],
        out_specs=pl.BlockSpec((1, 1, N, d), lambda b, h: (b, h, 0, 0)),
        out_shape=jax.ShapeDtypeStruct((B, nh, N, d), jnp.float32),
        compiler_params=pltpu.CompilerParams(
            dimension_semantics=("parallel", "parallel"),
            vmem_limit_bytes=_VMEM_LIMIT),
    )(q, k, v, pos_emb)


# --------------------- output projection (row-tiled 1x1 conv + bias) ---------------------

def _proj_kernel(x_ref, w_ref, b_ref, o_ref):
    o_ref[...] = (jnp.dot(x_ref[...], w_ref[...],
                          preferred_element_type=jnp.float32) + b_ref[...])


def _pick_row_tile(M, target=256):
    if M <= target:
        return M
    for t in range(target, 7, -8):     # multiples of 8 only (sublane rule)
        if M % t == 0:
            return t
    return M


def project_out(x2d, w, b):
    """x2d: [M, C]  w: [C, C]  b: [C]  ->  [M, C]."""
    M, C = x2d.shape
    Cout = w.shape[-1]
    TM = _pick_row_tile(M)
    return pl.pallas_call(
        _proj_kernel,
        grid=(M // TM,),
        in_specs=[pl.BlockSpec((TM, C), lambda i: (i, 0)),
                  pl.BlockSpec((C, Cout), lambda i: (0, 0)),   # resident weight
                  pl.BlockSpec((1, Cout), lambda i: (0, 0))],  # resident bias
        out_specs=pl.BlockSpec((TM, Cout), lambda i: (i, 0)),
        out_shape=jax.ShapeDtypeStruct((M, Cout), jnp.float32),
        compiler_params=pltpu.CompilerParams(
            dimension_semantics=("parallel",),
            vmem_limit_bytes=_VMEM_LIMIT),
    )(x2d, w, b.reshape(1, Cout))


# ------------------------------- full forward ---------------------------------

def non_local_msa(x, params, num_heads, window_num):
    """x: [B, C, H, W] (NCHW)  ->  [B, C, H, W]."""
    B, C, H, W = x.shape
    wn0, wn1 = window_num
    b0, b1 = H // wn0, W // wn1
    N = wn0 * wn1
    d = (b0 * b1 * C) // num_heads

    x_nhwc = jnp.transpose(x, (0, 2, 3, 1))                       # [B,H,W,C]

    # fused qkv(x) + qkv_dwconv(...)  — one pallas_call, one HBM pass
    qkv = qkv_dwconv(x_nhwc, params['w_qkv'], params['w_dw'])     # [B,H,W,3C]
    q, k, v = jnp.split(qkv, 3, axis=-1)                          # each [B,H,W,C]

    # 'b c (h b0) (w b1) -> b (h w) (b0 b1 c)'  then  'b n (h d) -> b h n d'
    def to_tokens(t):
        t = t.reshape(B, wn0, b0, wn1, b1, C)
        t = jnp.transpose(t, (0, 1, 3, 2, 4, 5))                  # [B,wn0,wn1,b0,b1,C]
        t = t.reshape(B, N, num_heads, d)
        return jnp.transpose(t, (0, 2, 1, 3))                     # [B,heads,N,d]

    q, k, v = map(to_tokens, (q, k, v))

    head_dim = (H // wn0) * (W // wn1) * C / num_heads            # as in forward()
    scale = head_dim ** (-0.5)

    out = window_attention(q, k, v, params['pos_emb'], scale)     # [B,heads,N,d]

    # inverse rearranges back to per-pixel channels-last rows
    out = jnp.transpose(out, (0, 2, 1, 3)).reshape(B, N, b0 * b1 * C)
    out = out.reshape(B, wn0, wn1, b0, b1, C)
    out = jnp.transpose(out, (0, 1, 3, 2, 4, 5)).reshape(B * H * W, C)

    # project_out (1x1 conv with bias), tiled over token rows
    out = project_out(out, params['w_proj'], params['b_proj'])
    out = out.reshape(B, H, W, C)
    return jnp.transpose(out, (0, 3, 1, 2))                       # back to NCHW


def init_params(key, dim, num_heads, window_num):
    k1, k2, k3, k4, k5 = jax.random.split(key, 5)
    N = window_num[0] * window_num[1]
    # deterministic synthetic init (shapes match the PyTorch module)
    w_qkv = jax.random.normal(k1, (dim, 3 * dim), jnp.float32) / jnp.sqrt(dim)
    w_dw = jax.random.normal(k2, (3, 3, 3 * dim), jnp.float32) / 3.0
    w_proj = jax.random.normal(k3, (dim, dim), jnp.float32) / jnp.sqrt(dim)
    b_proj = 0.01 * jax.random.normal(k4, (dim,), jnp.float32)
    # trunc_normal_(pos_emb): standard normal truncated to [-2, 2]
    pos_emb = jax.random.truncated_normal(k5, -2.0, 2.0,
                                          (1, num_heads, N, N), jnp.float32)
    return dict(w_qkv=w_qkv, w_dw=w_dw, w_proj=w_proj, b_proj=b_proj,
                pos_emb=pos_emb)


if __name__ == "__main__":
    dim = 4
    num_heads = 2
    window_num = (4, 4)
    B, H, W = 2, 16, 16

    key = jax.random.PRNGKey(0)
    kx, kp = jax.random.split(key)
    x = jax.random.normal(kx, (B, dim, H, W), jnp.float32)        # NCHW input
    params = init_params(kp, dim, num_heads, window_num)

    out = non_local_msa(x, params, num_heads, window_num)
    out = jax.block_until_ready(out)
    assert out.shape == (B, dim, H, W), out.shape
    print("KERNEL_OK")
</pallas_src>

<mosaic_0001>
module attributes {stable_mosaic.version = 11 : i64} {
  func.func @_qkv_dwconv_kernel(%arg0: i32, %arg1: memref<1x16x16x4xf32, #tpu.memory_space<vmem>>, %arg2: memref<4x1x12xf32, #tpu.memory_space<vmem>>, %arg3: memref<3x3x1x12xf32, #tpu.memory_space<vmem>>, %arg4: memref<1x16x16x12xf32, #tpu.memory_space<vmem>>, %arg5: memref<18x18x12xf32, #tpu.memory_space<vmem>>) attributes {dimension_semantics = [#tpu.dimension_semantics<parallel>], iteration_bounds = array<i64: 2>, scalar_prefetch = 0 : i64, scratch_operands = 1 : i64, tpu.core_type = #tpu.core_type<tc>, window_params = [{transform_indices = @transform_0, window_bounds = array<i64: 1, 16, 16, 4>}, {pipeline_mode = #tpu.pipeline_mode<synchronous>, transform_indices = @transform_1, window_bounds = array<i64: 4, 1, 12>}, {pipeline_mode = #tpu.pipeline_mode<synchronous>, transform_indices = @transform_2, window_bounds = array<i64: 3, 3, 1, 12>}, {transform_indices = @transform_3, window_bounds = array<i64: 1, 16, 16, 12>}]} {
    %c0 = arith.constant 0 : index
    %c0_0 = arith.constant 0 : index
    %c0_1 = arith.constant 0 : index
    %c0_2 = arith.constant 0 : index
    %0 = vector.load %arg1[%c0, %c0_0, %c0_1, %c0_2] : memref<1x16x16x4xf32, #tpu.memory_space<vmem>>, vector<1x16x16x4xf32>
    %1 = vector.shape_cast %0 : vector<1x16x16x4xf32> to vector<16x16x4xf32>
    %2 = vector.extract_strided_slice %1 {offsets = [0, 0, 0], sizes = [16, 16, 1], strides = [1, 1, 1]} : vector<16x16x4xf32> to vector<16x16x1xf32>
    %c0_3 = arith.constant 0 : index
    %c0_4 = arith.constant 0 : index
    %c0_5 = arith.constant 0 : index
    %3 = vector.load %arg2[%c0_3, %c0_4, %c0_5] : memref<4x1x12xf32, #tpu.memory_space<vmem>>, vector<1x1x12xf32>
    %4 = vector.shape_cast %3 : vector<1x1x12xf32> to vector<1x12xf32>
    %5 = vector.shape_cast %4 : vector<1x12xf32> to vector<1x1x12xf32>
    %6 = vector.broadcast %2 : vector<16x16x1xf32> to vector<16x16x12xf32>
    %7 = vector.broadcast %5 : vector<1x1x12xf32> to vector<16x16x12xf32>
    %8 = arith.mulf %6, %7 : vector<16x16x12xf32>
    %9 = vector.extract_strided_slice %1 {offsets = [0, 0, 1], sizes = [16, 16, 1], strides = [1, 1, 1]} : vector<16x16x4xf32> to vector<16x16x1xf32>
    %c1 = arith.constant 1 : index
    %c0_6 = arith.constant 0 : index
    %c0_7 = arith.constant 0 : index
    %10 = vector.load %arg2[%c1, %c0_6, %c0_7] : memref<4x1x12xf32, #tpu.memory_space<vmem>>, vector<1x1x12xf32>
    %11 = vector.shape_cast %10 : vector<1x1x12xf32> to vector<1x12xf32>
    %12 = vector.shape_cast %11 : vector<1x12xf32> to vector<1x1x12xf32>
    %13 = vector.broadcast %9 : vector<16x16x1xf32> to vector<16x16x12xf32>
    %14 = vector.broadcast %12 : vector<1x1x12xf32> to vector<16x16x12xf32>
    %15 = arith.mulf %13, %14 : vector<16x16x12xf32>
    %16 = arith.addf %8, %15 : vector<16x16x12xf32>
    %17 = vector.extract_strided_slice %1 {offsets = [0, 0, 2], sizes = [16, 16, 1], strides = [1, 1, 1]} : vector<16x16x4xf32> to vector<16x16x1xf32>
    %c2 = arith.constant 2 : index
    %c0_8 = arith.constant 0 : index
    %c0_9 = arith.constant 0 : index
    %18 = vector.load %arg2[%c2, %c0_8, %c0_9] : memref<4x1x12xf32, #tpu.memory_space<vmem>>, vector<1x1x12xf32>
    %19 = vector.shape_cast %18 : vector<1x1x12xf32> to vector<1x12xf32>
    %20 = vector.shape_cast %19 : vector<1x12xf32> to vector<1x1x12xf32>
    %21 = vector.broadcast %17 : vector<16x16x1xf32> to vector<16x16x12xf32>
    %22 = vector.broadcast %20 : vector<1x1x12xf32> to vector<16x16x12xf32>
    %23 = arith.mulf %21, %22 : vector<16x16x12xf32>
    %24 = arith.addf %16, %23 : vector<16x16x12xf32>
    %25 = vector.extract_strided_slice %1 {offsets = [0, 0, 3], sizes = [16, 16, 1], strides = [1, 1, 1]} : vector<16x16x4xf32> to vector<16x16x1xf32>
    %c3 = arith.constant 3 : index
    %c0_10 = arith.constant 0 : index
    %c0_11 = arith.constant 0 : index
    %26 = vector.load %arg2[%c3, %c0_10, %c0_11] : memref<4x1x12xf32, #tpu.memory_space<vmem>>, vector<1x1x12xf32>
    %27 = vector.shape_cast %26 : vector<1x1x12xf32> to vector<1x12xf32>
    %28 = vector.shape_cast %27 : vector<1x12xf32> to vector<1x1x12xf32>
    %29 = vector.broadcast %25 : vector<16x16x1xf32> to vector<16x16x12xf32>
    %30 = vector.broadcast %28 : vector<1x1x12xf32> to vector<16x16x12xf32>
    %31 = arith.mulf %29, %30 : vector<16x16x12xf32>
    %32 = arith.addf %24, %31 : vector<16x16x12xf32>
    %cst = arith.constant 0.000000e+00 : f32
    %33 = vector.broadcast %cst : f32 to vector<18x18x12xf32>
    %c0_12 = arith.constant 0 : index
    %c0_13 = arith.constant 0 : index
    %c0_14 = arith.constant 0 : index
    %34 = vector.load %arg5[%c0_12, %c0_13, %c0_14] : memref<18x18x12xf32, #tpu.memory_space<vmem>>, vector<18x18x12xf32>
    tpu.vector_store %arg5[%c0_12, %c0_13, %c0_14], %33 {strides = array<i32>} : memref<18x18x12xf32, #tpu.memory_space<vmem>>, vector<18x18x12xf32>,
    %c1_15 = arith.constant 1 : index
    %c1_16 = arith.constant 1 : index
    %c0_17 = arith.constant 0 : index
    %35 = vector.load %arg5[%c1_15, %c1_16, %c0_17] : memref<18x18x12xf32, #tpu.memory_space<vmem>>, vector<16x16x12xf32>
    tpu.vector_store %arg5[%c1_15, %c1_16, %c0_17], %32 {strides = array<i32>} : memref<18x18x12xf32, #tpu.memory_space<vmem>>, vector<16x16x12xf32>,
    %cst_18 = arith.constant 0.000000e+00 : f32
    %36 = vector.broadcast %cst_18 : f32 to vector<16x16x12xf32>
    %c0_19 = arith.constant 0 : index
    %c0_20 = arith.constant 0 : index
    %c0_21 = arith.constant 0 : index
    %37 = vector.load %arg5[%c0_19, %c0_20, %c0_21] : memref<18x18x12xf32, #tpu.memory_space<vmem>>, vector<16x16x12xf32>
    %c0_22 = arith.constant 0 : index
    %c0_23 = arith.constant 0 : index
    %c0_24 = arith.constant 0 : index
    %c0_25 = arith.constant 0 : index
    %38 = vector.load %arg3[%c0_22, %c0_23, %c0_24, %c0_25] : memref<3x3x1x12xf32, #tpu.memory_space<vmem>>, vector<1x1x1x12xf32>
    %39 = vector.shape_cast %38 : vector<1x1x1x12xf32> to vector<1x12xf32>
    %40 = vector.shape_cast %39 : vector<1x12xf32> to vector<1x1x12xf32>
    %41 = vector.broadcast %40 : vector<1x1x12xf32> to vector<16x16x12xf32>
    %42 = arith.mulf %37, %41 : vector<16x16x12xf32>
    %43 = arith.addf %36, %42 : vector<16x16x12xf32>
    %c0_26 = arith.constant 0 : index
    %c1_27 = arith.constant 1 : index
    %c0_28 = arith.constant 0 : index
    %44 = vector.load %arg5[%c0_26, %c1_27, %c0_28] : memref<18x18x12xf32, #tpu.memory_space<vmem>>, vector<16x16x12xf32>
    %c0_29 = arith.constant 0 : index
    %c1_30 = arith.constant 1 : index
    %c0_31 = arith.constant 0 : index
    %c0_32 = arith.constant 0 : index
    %45 = vector.load %arg3[%c0_29, %c1_30, %c0_31, %c0_32] : memref<3x3x1x12xf32, #tpu.memory_space<vmem>>, vector<1x1x1x12xf32>
    %46 = vector.shape_cast %45 : vector<1x1x1x12xf32> to vector<1x12xf32>
    %47 = vector.shape_cast %46 : vector<1x12xf32> to vector<1x1x12xf32>
    %48 = vector.broadcast %47 : vector<1x1x12xf32> to vector<16x16x12xf32>
    %49 = arith.mulf %44, %48 : vector<16x16x12xf32>
    %50 = arith.addf %43, %49 : vector<16x16x12xf32>
    %c0_33 = arith.constant 0 : index
    %c2_34 = arith.constant 2 : index
    %c0_35 = arith.constant 0 : index
    %51 = vector.load %arg5[%c0_33, %c2_34, %c0_35] : memref<18x18x12xf32, #tpu.memory_space<vmem>>, vector<16x16x12xf32>
    %c0_36 = arith.constant 0 : index
    %c2_37 = arith.constant 2 : index
    %c0_38 = arith.constant 0 : index
    %c0_39 = arith.constant 0 : index
    %52 = vector.load %arg3[%c0_36, %c2_37, %c0_38, %c0_39] : memref<3x3x1x12xf32, #tpu.memory_space<vmem>>, vector<1x1x1x12xf32>
    %53 = vector.shape_cast %52 : vector<1x1x1x12xf32> to vector<1x12xf32>
    %54 = vector.shape_cast %53 : vector<1x12xf32> to vector<1x1x12xf32>
    %55 = vector.broadcast %54 : vector<1x1x12xf32> to vector<16x16x12xf32>
    %56 = arith.mulf %51, %55 : vector<16x16x12xf32>
    %57 = arith.addf %50, %56 : vector<16x16x12xf32>
    %c1_40 = arith.constant 1 : index
    %c0_41 = arith.constant 0 : index
    %c0_42 = arith.constant 0 : index
    %58 = vector.load %arg5[%c1_40, %c0_41, %c0_42] : memref<18x18x12xf32, #tpu.memory_space<vmem>>, vector<16x16x12xf32>
    %c1_43 = arith.constant 1 : index
    %c0_44 = arith.constant 0 : index
    %c0_45 = arith.constant 0 : index
    %c0_46 = arith.constant 0 : index
    %59 = vector.load %arg3[%c1_43, %c0_44, %c0_45, %c0_46] : memref<3x3x1x12xf32, #tpu.memory_space<vmem>>, vector<1x1x1x12xf32>
    %60 = vector.shape_cast %59 : vector<1x1x1x12xf32> to vector<1x12xf32>
    %61 = vector.shape_cast %60 : vector<1x12xf32> to vector<1x1x12xf32>
    %62 = vector.broadcast %61 : vector<1x1x12xf32> to vector<16x16x12xf32>
    %63 = arith.mulf %58, %62 : vector<16x16x12xf32>
    %64 = arith.addf %57, %63 : vector<16x16x12xf32>
    %c1_47 = arith.constant 1 : index
    %c1_48 = arith.constant 1 : index
    %c0_49 = arith.constant 0 : index
    %65 = vector.load %arg5[%c1_47, %c1_48, %c0_49] : memref<18x18x12xf32, #tpu.memory_space<vmem>>, vector<16x16x12xf32>
    %c1_50 = arith.constant 1 : index
    %c1_51 = arith.constant 1 : index
    %c0_52 = arith.constant 0 : index
    %c0_53 = arith.constant 0 : index
    %66 = vector.load %arg3[%c1_50, %c1_51, %c0_52, %c0_53] : memref<3x3x1x12xf32, #tpu.memory_space<vmem>>, vector<1x1x1x12xf32>
    %67 = vector.shape_cast %66 : vector<1x1x1x12xf32> to vector<1x12xf32>
    %68 = vector.shape_cast %67 : vector<1x12xf32> to vector<1x1x12xf32>
    %69 = vector.broadcast %68 : vector<1x1x12xf32> to vector<16x16x12xf32>
    %70 = arith.mulf %65, %69 : vector<16x16x12xf32>
    %71 = arith.addf %64, %70 : vector<16x16x12xf32>
    %c1_54 = arith.constant 1 : index
    %c2_55 = arith.constant 2 : index
    %c0_56 = arith.constant 0 : index
    %72 = vector.load %arg5[%c1_54, %c2_55, %c0_56] : memref<18x18x12xf32, #tpu.memory_space<vmem>>, vector<16x16x12xf32>
    %c1_57 = arith.constant 1 : index
    %c2_58 = arith.constant 2 : index
    %c0_59 = arith.constant 0 : index
    %c0_60 = arith.constant 0 : index
    %73 = vector.load %arg3[%c1_57, %c2_58, %c0_59, %c0_60] : memref<3x3x1x12xf32, #tpu.memory_space<vmem>>, vector<1x1x1x12xf32>
    %74 = vector.shape_cast %73 : vector<1x1x1x12xf32> to vector<1x12xf32>
    %75 = vector.shape_cast %74 : vector<1x12xf32> to vector<1x1x12xf32>
    %76 = vector.broadcast %75 : vector<1x1x12xf32> to vector<16x16x12xf32>
    %77 = arith.mulf %72, %76 : vector<16x16x12xf32>
    %78 = arith.addf %71, %77 : vector<16x16x12xf32>
    %c2_61 = arith.constant 2 : index
    %c0_62 = arith.constant 0 : index
    %c0_63 = arith.constant 0 : index
    %79 = vector.load %arg5[%c2_61, %c0_62, %c0_63] : memref<18x18x12xf32, #tpu.memory_space<vmem>>, vector<16x16x12xf32>
    %c2_64 = arith.constant 2 : index
    %c0_65 = arith.constant 0 : index
    %c0_66 = arith.constant 0 : index
    %c0_67 = arith.constant 0 : index
    %80 = vector.load %arg3[%c2_64, %c0_65, %c0_66, %c0_67] : memref<3x3x1x12xf32, #tpu.memory_space<vmem>>, vector<1x1x1x12xf32>
    %81 = vector.shape_cast %80 : vector<1x1x1x12xf32> to vector<1x12xf32>
    %82 = vector.shape_cast %81 : vector<1x12xf32> to vector<1x1x12xf32>
    %83 = vector.broadcast %82 : vector<1x1x12xf32> to vector<16x16x12xf32>
    %84 = arith.mulf %79, %83 : vector<16x16x12xf32>
    %85 = arith.addf %78, %84 : vector<16x16x12xf32>
    %c2_68 = arith.constant 2 : index
    %c1_69 = arith.constant 1 : index
    %c0_70 = arith.constant 0 : index
    %86 = vector.load %arg5[%c2_68, %c1_69, %c0_70] : memref<18x18x12xf32, #tpu.memory_space<vmem>>, vector<16x16x12xf32>
    %c2_71 = arith.constant 2 : index
    %c1_72 = arith.constant 1 : index
    %c0_73 = arith.constant 0 : index
    %c0_74 = arith.constant 0 : index
    %87 = vector.load %arg3[%c2_71, %c1_72, %c0_73, %c0_74] : memref<3x3x1x12xf32, #tpu.memory_space<vmem>>, vector<1x1x1x12xf32>
    %88 = vector.shape_cast %87 : vector<1x1x1x12xf32> to vector<1x12xf32>
    %89 = vector.shape_cast %88 : vector<1x12xf32> to vector<1x1x12xf32>
    %90 = vector.broadcast %89 : vector<1x1x12xf32> to vector<16x16x12xf32>
    %91 = arith.mulf %86, %90 : vector<16x16x12xf32>
    %92 = arith.addf %85, %91 : vector<16x16x12xf32>
    %c2_75 = arith.constant 2 : index
    %c2_76 = arith.constant 2 : index
    %c0_77 = arith.constant 0 : index
    %93 = vector.load %arg5[%c2_75, %c2_76, %c0_77] : memref<18x18x12xf32, #tpu.memory_space<vmem>>, vector<16x16x12xf32>
    %c2_78 = arith.constant 2 : index
    %c2_79 = arith.constant 2 : index
    %c0_80 = arith.constant 0 : index
    %c0_81 = arith.constant 0 : index
    %94 = vector.load %arg3[%c2_78, %c2_79, %c0_80, %c0_81] : memref<3x3x1x12xf32, #tpu.memory_space<vmem>>, vector<1x1x1x12xf32>
    %95 = vector.shape_cast %94 : vector<1x1x1x12xf32> to vector<1x12xf32>
    %96 = vector.shape_cast %95 : vector<1x12xf32> to vector<1x1x12xf32>
    %97 = vector.broadcast %96 : vector<1x1x12xf32> to vector<16x16x12xf32>
    %98 = arith.mulf %93, %97 : vector<16x16x12xf32>
    %99 = arith.addf %92, %98 : vector<16x16x12xf32>
    %c0_82 = arith.constant 0 : index
    %c0_83 = arith.constant 0 : index
    %c0_84 = arith.constant 0 : index
    %c0_85 = arith.constant 0 : index
    %100 = vector.load %arg4[%c0_82, %c0_83, %c0_84, %c0_85] : memref<1x16x16x12xf32, #tpu.memory_space<vmem>>, vector<1x16x16x12xf32>
    %101 = vector.shape_cast %100 : vector<1x16x16x12xf32> to vector<16x16x12xf32>
    %102 = vector.shape_cast %99 : vector<16x16x12xf32> to vector<1x16x16x12xf32>
    tpu.vector_store %arg4[%c0_82, %c0_83, %c0_84, %c0_85], %102 {strides = array<i32>} : memref<1x16x16x12xf32, #tpu.memory_space<vmem>>, vector<1x16x16x12xf32>,
    return
  }
  func.func @transform_0(%arg0: i32) -> (i32, i32, i32, i32) {
    %c0_i32 = arith.constant 0 : i32
    %c0_i32_0 = arith.constant 0 : i32
    %c0_i32_1 = arith.constant 0 : i32
    %c0_i32_2 = arith.constant 0 : i32
    return %arg0, %c0_i32, %c0_i32_0, %c0_i32_1 : i32, i32, i32, i32
  }
  func.func @transform_1(%arg0: i32) -> (i32, i32, i32) {
    %c0_i32 = arith.constant 0 : i32
    %c0_i32_0 = arith.constant 0 : i32
    %c0_i32_1 = arith.constant 0 : i32
    %c0_i32_2 = arith.constant 0 : i32
    return %c0_i32, %c0_i32_0, %c0_i32_1 : i32, i32, i32
  }
  func.func @transform_2(%arg0: i32) -> (i32, i32, i32, i32) {
    %c0_i32 = arith.constant 0 : i32
    %c0_i32_0 = arith.constant 0 : i32
    %c0_i32_1 = arith.constant 0 : i32
    %c0_i32_2 = arith.constant 0 : i32
    %c0_i32_3 = arith.constant 0 : i32
    return %c0_i32, %c0_i32_0, %c0_i32_1, %c0_i32_2 : i32, i32, i32, i32
  }
  func.func @transform_3(%arg0: i32) -> (i32, i32, i32, i32) {
    %c0_i32 = arith.constant 0 : i32
    %c0_i32_0 = arith.constant 0 : i32
    %c0_i32_1 = arith.constant 0 : i32
    %c0_i32_2 = arith.constant 0 : i32
    return %arg0, %c0_i32, %c0_i32_0, %c0_i32_1 : i32, i32, i32, i32
  }
}

</mosaic_0001>

<bundles_post_ra>
// kernel: tpu_custom_call.1
= control target key start
LH: loop header
LB: loop body
LE: loop exit
PB: predicated region body
PF: predicated region fallthrough
CT: control target
= control target key end

     0   :  { %s2215_s12 = smov 0   ;;  %s3610_s0 = inlined_call_operand.vmem [shape: f32[2,16,16,4], index: 0, kind: input, shape index: {}]   ;;  %s3611_s1 = inlined_call_operand.vmem [shape: f32[4,1,12], index: 1, kind: input, shape index: {}]   ;;  %s3612_s2 = inlined_call_operand.vmem [shape: f32[3,3,1,12], index: 2, kind: input, shape index: {}]   ;;  %s3613_s3 = inlined_call_operand.vmem [shape: f32[2,16,16,12], index: 3, kind: output, shape index: {}]  }
   0x1 LB: > { %s2114_s13 = sadd.s32 4294967295, %s2188_s12   ;;  %p2118_p0 = scmp.ge.s32.totalorder %s2188_s12, 1  ;;  %s2188_s12 = sphi %s2215_s12, %s13_s12  }
   0x2   : > { %p137_p1 = scmp.lt.s32.totalorder %s2188_s12, 3 }
   0x4   : > { %p138_p2 = pnand %p2118_p0, %p137_p1 }
   0x6   : > { %141 = sbr.rel (%p138_p2) target bundleno = 512 (0x200), region = 32 }
   0xd   : > { %p161_p3 = scmp.lt.s32.totalorder %s2114_s13, 1  ;;  %v2190_v0 = vmov 0   ;;  %v2191_v33 = vmov 1   ;;  %v2192_v36 = vmov 2   ;;  %v2480_v63 = vld [vmem:[%s3611_s1] ss:$0 sm:$0xff] }
   0xe   : > { %2165 = vset.pattern.permute.xlu1 %v2190_v0  ;;  %2164 = vset.pattern.permute.xlu0 %v2190_v0  ;;  %vm1002_vm0 = vcmask 97280   ;;  %vm1005_vm1 = vcmask 91136  }
   0xf   : > { %s3665_s13 = smov (!%p161_p3, %s2114_s13), 1 }
  0x10   : > { %s2149_s14 = sshll.u32 %s3665_s13, 8 }
  0x11   : > { %s2231_s17 = scalar_lea.vmem %s3610_s0, %s2149_s14  ;;  %s3015_s22 = scalar_lea.vmem %s3613_s3, %s2149_s14 }
  0x12   : > { %v2234_v1 = vld [vmem:[%s2231_s17 + $0x10] sm:$0xff]  ;;  %v2237_v2 = vld [vmem:[%s2231_s17] sm:$0xff]  ;;  %v2242_v3 = vld [vmem:[%s2231_s17 + $0x18] sm:$0xff] }
  0x13   : > { %216 = vperm.xlu1 %2165, %v2234_v1   ;;  %206 = vperm.xlu0 %2164, %v2237_v2   ;;  %v2245_v4 = vld [vmem:[%s2231_s17 + $0x8] sm:$0xff]  ;;  %v2253_v6 = vld [vmem:[%s2231_s17 + $0x20] sm:$0xff]  ;;  %v2258_v7 = vld [vmem:[%s2231_s17 + $0x38] sm:$0xff] }
  0x14   : > { %v2250_v5 = vld [vmem:[%s2231_s17 + $0x28] sm:$0xff]  ;;  %v2261_v8 = vld [vmem:[%s2231_s17 + $0x30] sm:$0xff]  ;;  %v2269_v10 = vld [vmem:[%s2231_s17 + $0x40] sm:$0xff] }
  0x15   : > { %v2266_v9 = vld [vmem:[%s2231_s17 + $0x48] sm:$0xff]  ;;  %v2274_v11 = vld [vmem:[%s2231_s17 + $0x58] sm:$0xff]  ;;  %v2277_v12 = vld [vmem:[%s2231_s17 + $0x50] sm:$0xff] }
  0x16   : > { %v2282_v13 = vld [vmem:[%s2231_s17 + $0x68] sm:$0xff]  ;;  %v2285_v14 = vld [vmem:[%s2231_s17 + $0x60] sm:$0xff]  ;;  %v2290_v15 = vld [vmem:[%s2231_s17 + $0x78] sm:$0xff] }
  0x17   : > { %221 = vperm.xlu1 %2165, %v2242_v3   ;;  %211 = vperm.xlu0 %2164, %v2245_v4   ;;  %v2293_v16 = vld [vmem:[%s2231_s17 + $0x70] sm:$0xff]  ;;  %v2298_v17 = vld [vmem:[%s2231_s17 + $0x88] sm:$0xff]  ;;  %v2301_v18 = vld [vmem:[%s2231_s17 + $0x80] sm:$0xff] }
  0x18   : > { %v2306_v19 = vld [vmem:[%s2231_s17 + $0x98] sm:$0xff]  ;;  %v2309_v20 = vld [vmem:[%s2231_s17 + $0x90] sm:$0xff]  ;;  %v2314_v21 = vld [vmem:[%s2231_s17 + $0xa8] sm:$0xff] }
  0x19   : > { %v2317_v22 = vld [vmem:[%s2231_s17 + $0xa0] sm:$0xff]  ;;  %v2322_v23 = vld [vmem:[%s2231_s17 + $0xb8] sm:$0xff]  ;;  %v2325_v24 = vld [vmem:[%s2231_s17 + $0xb0] sm:$0xff] }
  0x1a   : > { %v2330_v25 = vld [vmem:[%s2231_s17 + $0xc8] sm:$0xff]  ;;  %v2333_v26 = vld [vmem:[%s2231_s17 + $0xc0] sm:$0xff]  ;;  %v2338_v27 = vld [vmem:[%s2231_s17 + $0xd8] sm:$0xff] }
  0x1b   : > { %231 = vperm.xlu1 %2165, %v2250_v5   ;;  %226 = vperm.xlu0 %2164, %v2253_v6   ;;  %v2341_v28 = vld [vmem:[%s2231_s17 + $0xd0] sm:$0xff]  ;;  %v2346_v29 = vld [vmem:[%s2231_s17 + $0xe8] sm:$0xff]  ;;  %v2349_v30 = vld [vmem:[%s2231_s17 + $0xe0] sm:$0xff] }
  0x1c   : > { %v2354_v31 = vld [vmem:[%s2231_s17 + $0xf8] sm:$0xff]  ;;  %v2357_v32 = vld [vmem:[%s2231_s17 + $0xf0] sm:$0xff] }
  0x1f   : > { %241 = vperm.xlu1 %2165, %v2258_v7   ;;  %236 = vperm.xlu0 %2164, %v2261_v8  }
  0x23   : > { %251 = vperm.xlu1 %2165, %v2266_v9   ;;  %246 = vperm.xlu0 %2164, %v2269_v10  }
  0x27   : > { %261 = vperm.xlu1 %2165, %v2274_v11   ;;  %256 = vperm.xlu0 %2164, %v2277_v12  }
  0x2b   : > { %271 = vperm.xlu1 %2165, %v2282_v13   ;;  %266 = vperm.xlu0 %2164, %v2285_v14  }
  0x2f   : > { %281 = vperm.xlu1 %2165, %v2290_v15   ;;  %276 = vperm.xlu0 %2164, %v2293_v16  }
  0x33   : > { %291 = vperm.xlu1 %2165, %v2298_v17   ;;  %286 = vperm.xlu0 %2164, %v2301_v18  }
  0x37   : > { %301 = vperm.xlu1 %2165, %v2306_v19   ;;  %296 = vperm.xlu0 %2164, %v2309_v20  }
  0x3b   : > { %311 = vperm.xlu1 %2165, %v2314_v21   ;;  %306 = vperm.xlu0 %2164, %v2317_v22  }
  0x3f   : > { %321 = vperm.xlu1 %2165, %v2322_v23   ;;  %316 = vperm.xlu0 %2164, %v2325_v24  }
  0x43   : > { %331 = vperm.xlu1 %2165, %v2330_v25   ;;  %326 = vperm.xlu0 %2164, %v2333_v26  }
  0x47   : > { %341 = vperm.xlu1 %2165, %v2338_v27   ;;  %336 = vperm.xlu0 %2164, %v2341_v28  }
  0x4b   : > { %351 = vperm.xlu1 %2165, %v2346_v29   ;;  %346 = vperm.xlu0 %2164, %v2349_v30  }
  0x4f   : > { %361 = vperm.xlu1 %2165, %v2354_v31   ;;  %356 = vperm.xlu0 %2164, %v2357_v32  }
  0x53   : > { %2167 = vset.pattern.permute.xlu1 %v2191_v33  ;;  %2166 = vset.pattern.permute.xlu0 %v2191_v33 }
  0x54   : > { %409 = vperm.xlu1 %2167, %v2245_v4   ;;  %405 = vperm.xlu0 %2166, %v2237_v2  }
  0x58   : > { %413 = vperm.xlu1 %2167, %v2234_v1   ;;  %417 = vperm.xlu0 %2166, %v2242_v3  }
  0x5c   : > { %421 = vperm.xlu1 %2167, %v2253_v6   ;;  %425 = vperm.xlu0 %2166, %v2250_v5  }
  0x60   : > { %429 = vperm.xlu1 %2167, %v2261_v8   ;;  %433 = vperm.xlu0 %2166, %v2258_v7  }
  0x64   : > { %437 = vperm.xlu1 %2167, %v2269_v10   ;;  %441 = vperm.xlu0 %2166, %v2266_v9  }
  0x68   : > { %445 = vperm.xlu1 %2167, %v2277_v12   ;;  %449 = vperm.xlu0 %2166, %v2274_v11  }
  0x6c   : > { %453 = vperm.xlu1 %2167, %v2285_v14   ;;  %457 = vperm.xlu0 %2166, %v2282_v13  }
  0x70   : > { %461 = vperm.xlu1 %2167, %v2293_v16   ;;  %465 = vperm.xlu0 %2166, %v2290_v15  }
  0x74   : > { %469 = vperm.xlu1 %2167, %v2301_v18   ;;  %473 = vperm.xlu0 %2166, %v2298_v17  }
  0x78   : > { %477 = vperm.xlu1 %2167, %v2309_v20   ;;  %481 = vperm.xlu0 %2166, %v2306_v19  }
  0x7c   : > { %485 = vperm.xlu1 %2167, %v2317_v22   ;;  %489 = vperm.xlu0 %2166, %v2314_v21  }
  0x80   : > { %493 = vperm.xlu1 %2167, %v2325_v24   ;;  %497 = vperm.xlu0 %2166, %v2322_v23  }
  0x84   : > { %501 = vperm.xlu1 %2167, %v2333_v26   ;;  %505 = vperm.xlu0 %2166, %v2330_v25  }
  0x88   : > { %509 = vperm.xlu1 %2167, %v2341_v28   ;;  %513 = vperm.xlu0 %2166, %v2338_v27  }
  0x8c   : > { %517 = vperm.xlu1 %2167, %v2349_v30   ;;  %521 = vperm.xlu0 %2166, %v2346_v29  }
  0x90   : > { %525 = vperm.xlu1 %2167, %v2357_v32   ;;  %529 = vperm.xlu0 %2166, %v2354_v31  }
  0x92   : > { %v2393_v34 = vpop.permute.xlu1 %216  ;;  %v2395_v35 = vpop.permute.xlu0 %206 }
  0x93   : > { %3614 = vst [vmem:[#allocation3_spill] sm:$0xff] %v2395_v35 }
  0x94   : > { %2168 = vset.pattern.permute.xlu1 %v2192_v36  ;;  %2169 = vset.pattern.permute.xlu0 %v2192_v36 }
  0x95   : > { %605 = vperm.xlu1 %2168, %v2237_v2   ;;  %609 = vperm.xlu0 %2169, %v2245_v4  }
  0x96   : > { %v2399_v37 = vpop.permute.xlu1 %221  ;;  %v2401_v38 = vpop.permute.xlu0 %211 }
  0x97   : > { %3615 = vst [vmem:[#allocation4_spill] sm:$0xff] %v2399_v37 }
  0x99   : > { %613 = vperm.xlu1 %2168, %v2234_v1   ;;  %621 = vperm.xlu0 %2169, %v2253_v6  }
  0x9a   : > { %v2405_v39 = vpop.permute.xlu1 %231  ;;  %v2407_v40 = vpop.permute.xlu0 %226 }
  0x9b   : > { %3616 = vst [vmem:[#allocation5_spill] sm:$0xff] %v2405_v39  ;;  %v2194_v39 = vmov 0.0  }
  0x9c   : > { %1003 = vst.msk [vmem:[#allocation2] sm:$0xff] %vm1002_vm0, %v2194_v39  ;;  %1004 = vst.msk [vmem:[#allocation2 + $0x8] sm:$0xff] %vm1002_vm0, %v2194_v39 }
  0x9d   : > { %617 = vperm.xlu1 %2168, %v2242_v3   ;;  %629 = vperm.xlu0 %2169, %v2261_v8   ;;  %1007 = vst.msk [vmem:[#allocation2 + $0x18] sm:$0xff] %vm1002_vm0, %v2194_v39  ;;  %1008 = vst.msk [vmem:[#allocation2 + $0x20] sm:$0xff] %vm1002_vm0, %v2194_v39 }
  0x9e   : > { %v2411_v41 = vpop.permute.xlu1 %241  ;;  %v2413_v42 = vpop.permute.xlu0 %236  ;;  %1010 = vst.msk [vmem:[#allocation2 + $0x30] sm:$0xff] %vm1002_vm0, %v2194_v39  ;;  %1011 = vst.msk [vmem:[#allocation2 + $0x38] sm:$0xff] %vm1002_vm0, %v2194_v39 }
  0x9f   : > { %3617 = vst [vmem:[#allocation6_spill] sm:$0xff] %v2411_v41  ;;  %v2193_v41 = vmov 3   ;;  %1013 = vst.msk [vmem:[#allocation2 + $0x48] sm:$0xff] %vm1002_vm0, %v2194_v39 }
  0xa0   : > { %1014 = vst.msk [vmem:[#allocation2 + $0x50] sm:$0xff] %vm1002_vm0, %v2194_v39  ;;  %1016 = vst.msk [vmem:[#allocation2 + $0x60] sm:$0xff] %vm1002_vm0, %v2194_v39 }
  0xa1   : > { %625 = vperm.xlu1 %2168, %v2250_v5   ;;  %637 = vperm.xlu0 %2169, %v2269_v10   ;;  %1017 = vst.msk [vmem:[#allocation2 + $0x68] sm:$0xff] %vm1002_vm0, %v2194_v39  ;;  %1019 = vst.msk [vmem:[#allocation2 + $0x78] sm:$0xff] %vm1002_vm0, %v2194_v39 }
  0xa2   : > { %v2417_v43 = vpop.permute.xlu1 %251  ;;  %v2419_v44 = vpop.permute.xlu0 %246  ;;  %1020 = vst.msk [vmem:[#allocation2 + $0x80] sm:$0xff] %vm1002_vm0, %v2194_v39  ;;  %1022 = vst.msk [vmem:[#allocation2 + $0x90] sm:$0xff] %vm1002_vm0, %v2194_v39 }
  0xa3   : > { %1023 = vst.msk [vmem:[#allocation2 + $0x98] sm:$0xff] %vm1002_vm0, %v2194_v39  ;;  %1025 = vst.msk [vmem:[#allocation2 + $0xa8] sm:$0xff] %vm1002_vm0, %v2194_v39 }
  0xa4   : > { %1026 = vst.msk [vmem:[#allocation2 + $0xb0] sm:$0xff] %vm1002_vm0, %v2194_v39  ;;  %1028 = vst.msk [vmem:[#allocation2 + $0xc0] sm:$0xff] %vm1002_vm0, %v2194_v39 }
  0xa5   : > { %633 = vperm.xlu1 %2168, %v2258_v7   ;;  %645 = vperm.xlu0 %2169, %v2277_v12   ;;  %1029 = vst.msk [vmem:[#allocation2 + $0xc8] sm:$0xff] %vm1002_vm0, %v2194_v39  ;;  %1031 = vst.msk [vmem:[#allocation2 + $0xd8] sm:$0xff] %vm1002_vm0, %v2194_v39 }
  0xa6   : > { %v2423_v45 = vpop.permute.xlu1 %261  ;;  %v2425_v46 = vpop.permute.xlu0 %256  ;;  %1032 = vst.msk [vmem:[#allocation2 + $0xe0] sm:$0xff] %vm1002_vm0, %v2194_v39  ;;  %1034 = vst.msk [vmem:[#allocation2 + $0xf0] sm:$0xff] %vm1002_vm0, %v2194_v39 }
  0xa7   : > { %1035 = vst.msk [vmem:[#allocation2 + $0xf8] sm:$0xff] %vm1002_vm0, %v2194_v39  ;;  %1037 = vst.msk [vmem:[#allocation2 + $0x108] sm:$0xff] %vm1002_vm0, %v2194_v39 }
  0xa8   : > { %1038 = vst.msk [vmem:[#allocation2 + $0x110] sm:$0xff] %vm1002_vm0, %v2194_v39  ;;  %1040 = vst.msk [vmem:[#allocation2 + $0x120] sm:$0xff] %vm1002_vm0, %v2194_v39 }
  0xa9   : > { %641 = vperm.xlu1 %2168, %v2266_v9   ;;  %653 = vperm.xlu0 %2169, %v2285_v14   ;;  %1041 = vst.msk [vmem:[#allocation2 + $0x128] sm:$0xff] %vm1002_vm0, %v2194_v39  ;;  %1043 = vst.msk [vmem:[#allocation2 + $0x138] sm:$0xff] %vm1002_vm0, %v2194_v39 }
  0xaa   : > { %v2429_v47 = vpop.permute.xlu1 %271  ;;  %v2431_v48 = vpop.permute.xlu0 %266  ;;  %1044 = vst.msk [vmem:[#allocation2 + $0x140] sm:$0xff] %vm1002_vm0, %v2194_v39  ;;  %1046 = vst.msk [vmem:[#allocation2 + $0x150] sm:$0xff] %vm1002_vm0, %v2194_v39 }
  0xab   : > { %1047 = vst.msk [vmem:[#allocation2 + $0x158] sm:$0xff] %vm1002_vm0, %v2194_v39  ;;  %1049 = vst.msk [vmem:[#allocation2 + $0x168] sm:$0xff] %vm1002_vm0, %v2194_v39 }
  0xac   : > { %1050 = vst.msk [vmem:[#allocation2 + $0x170] sm:$0xff] %vm1002_vm0, %v2194_v39  ;;  %1052 = vst.msk [vmem:[#allocation2 + $0x180] sm:$0xff] %vm1002_vm0, %v2194_v39 }
  0xad   : > { %649 = vperm.xlu1 %2168, %v2274_v11   ;;  %661 = vperm.xlu0 %2169, %v2293_v16   ;;  %1053 = vst.msk [vmem:[#allocation2 + $0x188] sm:$0xff] %vm1002_vm0, %v2194_v39  ;;  %1055 = vst.msk [vmem:[#allocation2 + $0x198] sm:$0xff] %vm1002_vm0, %v2194_v39 }
  0xae   : > { %v2435_v49 = vpop.permute.xlu1 %281  ;;  %v2437_v50 = vpop.permute.xlu0 %276  ;;  %1056 = vst.msk [vmem:[#allocation2 + $0x1a0] sm:$0xff] %vm1002_vm0, %v2194_v39 }
  0xaf   : > { %1012 = vst.msk [vmem:[#allocation2 + $0x40] sm:$0x3] %vm1005_vm1, %v2194_v39  ;;  %1006 = vst.msk [vmem:[#allocation2 + $0x10] sm:$0x3] %vm1005_vm1, %v2194_v39 }
  0xb0   : > { %1009 = vst.msk [vmem:[#allocation2 + $0x28] sm:$0x3] %vm1005_vm1, %v2194_v39  ;;  %1015 = vst.msk [vmem:[#allocation2 + $0x58] sm:$0x3] %vm1005_vm1, %v2194_v39 }
  0xb1   : > { %657 = vperm.xlu1 %2168, %v2282_v13   ;;  %669 = vperm.xlu0 %2169, %v2301_v18   ;;  %1018 = vst.msk [vmem:[#allocation2 + $0x70] sm:$0x3] %vm1005_vm1, %v2194_v39  ;;  %1021 = vst.msk [vmem:[#allocation2 + $0x88] sm:$0x3] %vm1005_vm1, %v2194_v39 }
  0xb2   : > { %v2441_v51 = vpop.permute.xlu1 %291  ;;  %v2443_v52 = vpop.permute.xlu0 %286  ;;  %1024 = vst.msk [vmem:[#allocation2 + $0xa0] sm:$0x3] %vm1005_vm1, %v2194_v39  ;;  %1027 = vst.msk [vmem:[#allocation2 + $0xb8] sm:$0x3] %vm1005_vm1, %v2194_v39 }
  0xb3   : > { %1030 = vst.msk [vmem:[#allocation2 + $0xd0] sm:$0x3] %vm1005_vm1, %v2194_v39  ;;  %1033 = vst.msk [vmem:[#allocation2 + $0xe8] sm:$0x3] %vm1005_vm1, %v2194_v39 }
  0xb4   : > { %1036 = vst.msk [vmem:[#allocation2 + $0x100] sm:$0x3] %vm1005_vm1, %v2194_v39  ;;  %1039 = vst.msk [vmem:[#allocation2 + $0x118] sm:$0x3] %vm1005_vm1, %v2194_v39 }
  0xb5   : > { %665 = vperm.xlu1 %2168, %v2290_v15   ;;  %677 = vperm.xlu0 %2169, %v2309_v20   ;;  %1042 = vst.msk [vmem:[#allocation2 + $0x130] sm:$0x3] %vm1005_vm1, %v2194_v39  ;;  %1045 = vst.msk [vmem:[#allocation2 + $0x148] sm:$0x3] %vm1005_vm1, %v2194_v39 }
  0xb6   : > { %v2447_v53 = vpop.permute.xlu1 %301  ;;  %v2449_v54 = vpop.permute.xlu0 %296  ;;  %1048 = vst.msk [vmem:[#allocation2 + $0x160] sm:$0x3] %vm1005_vm1, %v2194_v39  ;;  %1051 = vst.msk [vmem:[#allocation2 + $0x178] sm:$0x3] %vm1005_vm1, %v2194_v39 }
  0xb7   : > { %3618 = vst [vmem:[#allocation7_spill] sm:$0xff] %v2447_v53  ;;  %1054 = vst.msk [vmem:[#allocation2 + $0x190] sm:$0x3] %vm1005_vm1, %v2194_v39 }
  0xb8   : > { %1057 = vst.msk [vmem:[#allocation2 + $0x1a8] sm:$0x3] %vm1005_vm1, %v2194_v39 }
  0xb9   : > { %673 = vperm.xlu1 %2168, %v2298_v17   ;;  %685 = vperm.xlu0 %2169, %v2317_v22  }
  0xba   : > { %v2453_v55 = vpop.permute.xlu1 %311  ;;  %v2455_v56 = vpop.permute.xlu0 %306 }
  0xbb   : > { %3619 = vst [vmem:[#allocation8_spill] sm:$0xff] %v2453_v55 }
  0xbd   : > { %681 = vperm.xlu1 %2168, %v2306_v19   ;;  %693 = vperm.xlu0 %2169, %v2325_v24  }
  0xbe   : > { %v2459_v57 = vpop.permute.xlu1 %321  ;;  %v2461_v58 = vpop.permute.xlu0 %316 }
  0xbf   : > { %3620 = vst [vmem:[#allocation9_spill] sm:$0xff] %v2459_v57 }
  0xc1   : > { %689 = vperm.xlu1 %2168, %v2314_v21   ;;  %701 = vperm.xlu0 %2169, %v2333_v26  }
  0xc2   : > { %v2465_v59 = vpop.permute.xlu1 %331  ;;  %v2467_v60 = vpop.permute.xlu0 %326 }
  0xc5   : > { %697 = vperm.xlu1 %2168, %v2322_v23   ;;  %709 = vperm.xlu0 %2169, %v2341_v28  }
  0xc6   : > { %v2471_v61 = vpop.permute.xlu1 %341  ;;  %v2473_v62 = vpop.permute.xlu0 %336 }
  0xc9   : > { %705 = vperm.xlu1 %2168, %v2330_v25   ;;  %717 = vperm.xlu0 %2169, %v2349_v30  }
  0xca   : > { %v2482_v0 = vpop.permute.xlu1 %351  ;;  %v347_v33 = vpop.permute.xlu0 %346 }
  0xcb   : > { %v2485_v36 = vmul.f32 %v2480_v63, %v347_v33 }
  0xcd   : > { %713 = vperm.xlu1 %2168, %v2338_v27   ;;  %725 = vperm.xlu0 %2169, %v2357_v32  }
  0xce   : > { %v2489_v57 = vpop.permute.xlu1 %361  ;;  %v357_v55 = vpop.permute.xlu0 %356 }
  0xcf   : > { %v2492_v53 = vmul.f32 %v2480_v63, %v357_v55 }
  0xd1   : > { %721 = vperm.xlu1 %2168, %v2346_v29   ;;  %2170 = vset.pattern.permute.xlu0 %v2193_v41 }
  0xd2   : > { %805 = vperm.xlu0 %2170, %v2237_v2  }
  0xd3   : > { %v2532_v2 = vpop.permute.xlu1 %409  ;;  %v2534_v55 = vpop.permute.xlu0 %405 }
  0xd5   : > { %729 = vperm.xlu1 %2168, %v2354_v31  }
  0xd6   : > { %817 = vperm.xlu0 %2170, %v2242_v3  }
  0xd7   : > { %v2538_v33 = vpop.permute.xlu1 %413  ;;  %v2540_v37 = vpop.permute.xlu0 %417 }
  0xd8   : > { %3621 = vst [vmem:[#allocation10_spill] sm:$0xff] %v2540_v37 }
  0xd9   : > { %2171 = vset.pattern.permute.xlu1 %v2193_v41 }
  0xda   : > { %809 = vperm.xlu1 %2171, %v2245_v4   ;;  %825 = vperm.xlu0 %2170, %v2250_v5  }
  0xdb   : > { %v2562_v3 = vpop.permute.xlu1 %421  ;;  %v2564_v41 = vpop.permute.xlu0 %425 }
  0xdc   : > { %3622 = vst [vmem:[#allocation11_spill] sm:$0xff] %v2564_v41 }
  0xde   : > { %813 = vperm.xlu1 %2171, %v2234_v1   ;;  %833 = vperm.xlu0 %2170, %v2258_v7  }
  0xdf   : > { %v2568_v37 = vpop.permute.xlu1 %429  ;;  %v2570_v35 = vpop.permute.xlu0 %433 }
  0xe0   : > { %3623 = vst [vmem:[#allocation12_spill] sm:$0xff] %v2570_v35 }
  0xe2   : > { %821 = vperm.xlu1 %2171, %v2253_v6   ;;  %841 = vperm.xlu0 %2170, %v2266_v9  }
  0xe3   : > { %v2574_v39 = vpop.permute.xlu1 %437  ;;  %v2576_v4 = vpop.permute.xlu0 %441 }
  0xe6   : > { %829 = vperm.xlu1 %2171, %v2261_v8   ;;  %849 = vperm.xlu0 %2170, %v2274_v11  }
  0xe7   : > { %v2580_v5 = vpop.permute.xlu1 %445  ;;  %v2582_v1 = vpop.permute.xlu0 %449 }
  0xea   : > { %837 = vperm.xlu1 %2171, %v2269_v10   ;;  %857 = vperm.xlu0 %2170, %v2282_v13  }
  0xeb   : > { %v2586_v7 = vpop.permute.xlu1 %453  ;;  %v2588_v6 = vpop.permute.xlu0 %457 }
  0xee   : > { %845 = vperm.xlu1 %2171, %v2277_v12   ;;  %865 = vperm.xlu0 %2170, %v2290_v15  }
  0xef   : > { %v2592_v9 = vpop.permute.xlu1 %461  ;;  %v2594_v8 = vpop.permute.xlu0 %465 }
  0xf2   : > { %853 = vperm.xlu1 %2171, %v2285_v14   ;;  %873 = vperm.xlu0 %2170, %v2298_v17   ;;  %v2613_v14 = vld [vmem:[%s3611_s1 + $0x1] ss:$0 sm:$0xff] }
  0xf3   : > { %v2598_v11 = vpop.permute.xlu1 %469  ;;  %v2600_v10 = vpop.permute.xlu0 %473 }
  0xf6   : > { %861 = vperm.xlu1 %2171, %v2293_v16   ;;  %881 = vperm.xlu0 %2170, %v2306_v19   ;;  %v390_v16 = vmul.f32 %v2480_v63, %v2455_v56 }
  0xf7   : > { %v2604_v13 = vpop.permute.xlu1 %477  ;;  %v2606_v12 = vpop.permute.xlu0 %481 }
  0xf8   : > { %3624 = vst [vmem:[#allocation13_spill] sm:$0xff] %v2606_v12  ;;  %v392_v12 = vmul.f32 %v2480_v63, %v2461_v58 }
  0xfa   : > { %869 = vperm.xlu1 %2171, %v2301_v18   ;;  %889 = vperm.xlu0 %2170, %v2314_v21  }
  0xfb   : > { %v486_v15 = vpop.permute.xlu1 %485  ;;  %v2615_v17 = vpop.permute.xlu0 %489 }
  0xfc   : > { %3625 = vst [vmem:[#allocation14_spill] sm:$0xff] %v2615_v17  ;;  %v558_v19 = vmul.f32 %v2613_v14, %v486_v15 }
  0xfe   : > { %v2620_v35 = vadd.f32 %v558_v19, %v390_v16  ;;  %877 = vperm.xlu1 %2171, %v2309_v20   ;;  %897 = vperm.xlu0 %2170, %v2322_v23   ;;  %v395_v20 = vmul.f32 %v2480_v63, %v2465_v59  ;;  %v394_v23 = vmul.f32 %v2480_v63, %v2467_v60 }
  0xff   : > { %v494_v18 = vpop.permute.xlu1 %493  ;;  %v2624_v21 = vpop.permute.xlu0 %497  ;;  %v397_v59 = vmul.f32 %v2480_v63, %v2471_v61  ;;  %v396_v60 = vmul.f32 %v2480_v63, %v2473_v62  ;;  %v399_v61 = vmul.f32 %v2480_v63, %v2482_v0 }
 0x100   : > { %v560_v41 = vmul.f32 %v2613_v14, %v494_v18 }
 0x102   : > { %v2629_v17 = vadd.f32 %v560_v41, %v392_v12  ;;  %885 = vperm.xlu1 %2171, %v2317_v22   ;;  %905 = vperm.xlu0 %2170, %v2330_v25  }
 0x103   : > { %v502_v56 = vpop.permute.xlu1 %501  ;;  %v506_v15 = vpop.permute.xlu0 %505 }
 0x104   : > { %v562_v16 = vmul.f32 %v2613_v14, %v502_v56  ;;  %v563_v58 = vmul.f32 %v2613_v14, %v506_v15 }
 0x106   : > { %v2639_v19 = vadd.f32 %v562_v16, %v394_v23  ;;  %v2641_v41 = vadd.f32 %v563_v58, %v395_v20  ;;  %893 = vperm.xlu1 %2171, %v2325_v24   ;;  %913 = vperm.xlu0 %2170, %v2338_v27   ;;  %v401_v58 = vmul.f32 %v2480_v63, %v2489_v57 }
 0x107   : > { %v510_v22 = vpop.permute.xlu1 %509  ;;  %v514_v25 = vpop.permute.xlu0 %513  ;;  %v540_v57 = vmul.f32 %v2613_v14, %v2538_v33 }
 0x108   : > { %v564_v12 = vmul.f32 %v2613_v14, %v510_v22  ;;  %v565_v18 = vmul.f32 %v2613_v14, %v514_v25  ;;  %v539_v25 = vmul.f32 %v2613_v14, %v2532_v2 }
 0x10a   : > { %v2651_v56 = vadd.f32 %v564_v12, %v396_v60  ;;  %v2653_v15 = vadd.f32 %v565_v18, %v397_v59  ;;  %901 = vperm.xlu1 %2171, %v2333_v26   ;;  %921 = vperm.xlu0 %2170, %v2346_v29   ;;  %v542_v12 = vmul.f32 %v2613_v14, %v2562_v3 }
 0x10b   : > { %v518_v24 = vpop.permute.xlu1 %517  ;;  %v522_v27 = vpop.permute.xlu0 %521  ;;  %v372_v18 = vmul.f32 %v2480_v63, %v2393_v34  ;;  %v376_v34 = vmul.f32 %v2480_v63, %v2413_v42 }
 0x10c   : > { %v566_v20 = vmul.f32 %v2613_v14, %v518_v24  ;;  %v567_v62 = vmul.f32 %v2613_v14, %v522_v27 }
 0x10d   : > { %v572_v33 = vadd.f32 %v540_v57, %v372_v18  ;;  %v547_v18 = vmul.f32 %v2613_v14, %v2576_v4  ;;  %v549_v4 = vmul.f32 %v2613_v14, %v2582_v1 }
 0x10e   : > { %v2662_v23 = vadd.f32 %v566_v20, %v2485_v36  ;;  %v2664_v16 = vadd.f32 %v567_v62, %v399_v61  ;;  %909 = vperm.xlu1 %2171, %v2341_v28   ;;  %929 = vperm.xlu0 %2170, %v2354_v31   ;;  %v2683_v28 = vld [vmem:[%s3611_s1 + $0x2] ss:$0 sm:$0xff]  ;;  %v371_v31 = vmul.f32 %v2480_v63, %v2401_v38 }
 0x10f   : > { %v526_v26 = vpop.permute.xlu1 %525  ;;  %v530_v29 = vpop.permute.xlu0 %529  ;;  %v374_v38 = vmul.f32 %v2480_v63, %v2407_v40  ;;  %v544_v62 = vmul.f32 %v2613_v14, %v2568_v37 }
 0x110   : > { %v568_v0 = vmul.f32 %v2613_v14, %v526_v26  ;;  %v569_v22 = vmul.f32 %v2613_v14, %v530_v29 }
 0x111   : > { %v574_v20 = vadd.f32 %v542_v12, %v374_v38 }
 0x112   : > { %v2675_v36 = vadd.f32 %v568_v0, %v2492_v53  ;;  %v2677_v59 = vadd.f32 %v569_v22, %v401_v58  ;;  %917 = vperm.xlu1 %2171, %v2349_v30   ;;  %v571_v53 = vadd.f32 %v539_v25, %v371_v31  ;;  %v576_v0 = vadd.f32 %v544_v62, %v376_v34 }
 0x113   : > { %v546_v22 = vmul.f32 %v2613_v14, %v2574_v39  ;;  %v378_v25 = vmul.f32 %v2480_v63, %v2419_v44 }
 0x114   : > { %v2689_v60 = vpop.permute.xlu1 %605  ;;  %v610_v2 = vpop.permute.xlu0 %609 }
 0x115   : > { %v739_v30 = vmul.f32 %v2683_v28, %v610_v2  ;;  %v578_v2 = vadd.f32 %v546_v22, %v378_v25  ;;  %v551_v25 = vmul.f32 %v2613_v14, %v2588_v6 }
 0x116   : > { %925 = vperm.xlu1 %2171, %v2357_v32  }
 0x117   : > { %v2699_v24 = vadd.f32 %v739_v30, %v571_v53  ;;  %v548_v53 = vmul.f32 %v2613_v14, %v2580_v5  ;;  %v380_v30 = vmul.f32 %v2480_v63, %v2425_v46  ;;  %v379_v5 = vmul.f32 %v2480_v63, %v2417_v43 }
 0x118   : > { %v614_v27 = vpop.permute.xlu1 %613  ;;  %v622_v61 = vpop.permute.xlu0 %621  ;;  %v382_v46 = vmul.f32 %v2480_v63, %v2431_v48  ;;  %v381_v43 = vmul.f32 %v2480_v63, %v2423_v45  ;;  %v384_v48 = vmul.f32 %v2480_v63, %v2437_v50  ;;  %v383_v50 = vmul.f32 %v2480_v63, %v2429_v47 }
 0x119   : > { %v740_v3 = vmul.f32 %v2683_v28, %v614_v27  ;;  %v742_v26 = vmul.f32 %v2683_v28, %v622_v61  ;;  %v550_v27 = vmul.f32 %v2613_v14, %v2586_v7  ;;  %v579_v62 = vadd.f32 %v547_v18, %v379_v5 }
 0x11a   : > { %v552_v7 = vmul.f32 %v2613_v14, %v2592_v9  ;;  %v581_v1 = vadd.f32 %v549_v4, %v381_v43  ;;  %v583_v6 = vadd.f32 %v551_v25, %v383_v50  ;;  %v556_v5 = vmul.f32 %v2613_v14, %v2604_v13 }
 0x11b   : > { %v2707_v32 = vadd.f32 %v740_v3, %v572_v33  ;;  %v2709_v29 = vadd.f32 %v742_v26, %v574_v20  ;;  %v580_v33 = vadd.f32 %v548_v53, %v380_v30  ;;  %v582_v34 = vadd.f32 %v550_v27, %v382_v46 }
 0x11c   : > { %v2711_v40 = vpop.permute.xlu1 %617  ;;  %v630_v58 = vpop.permute.xlu0 %629  ;;  %v554_v53 = vmul.f32 %v2613_v14, %v2598_v11  ;;  %v386_v30 = vmul.f32 %v2480_v63, %v2443_v52  ;;  %v385_v52 = vmul.f32 %v2480_v63, %v2435_v49  ;;  %v555_v13 = vmul.f32 %v2613_v14, %v2600_v10 }
 0x11d   : > { %v744_v37 = vmul.f32 %v2683_v28, %v630_v58  ;;  %v387_v49 = vmul.f32 %v2480_v63, %v2441_v51 }
 0x11f   : > { %v2718_v31 = vadd.f32 %v744_v37, %v576_v0  ;;  %v587_v25 = vadd.f32 %v555_v13, %v387_v49  ;;  %v3634_v13 = vld [vmem:[#allocation3_spill] sm:$0xff]  ;;  %v3637_v49 = vld [vmem:[#allocation10_spill] sm:$0xff] }
 0x120   : > { %v2720_v57 = vpop.permute.xlu1 %625  ;;  %v638_v42 = vpop.permute.xlu0 %637 }
 0x121   : > { %v746_v12 = vmul.f32 %v2683_v28, %v638_v42 }
 0x123   : > { %v2727_v39 = vadd.f32 %v746_v12, %v578_v2  ;;  %v584_v2 = vadd.f32 %v552_v7, %v384_v48 }
 0x124   : > { %v2731_v44 = vpop.permute.xlu1 %633  ;;  %v646_v38 = vpop.permute.xlu0 %645 }
 0x125   : > { %v748_v61 = vmul.f32 %v2683_v28, %v646_v38 }
 0x127   : > { %v2740_v20 = vadd.f32 %v748_v61, %v580_v33  ;;  %v553_v33 = vmul.f32 %v2613_v14, %v2594_v8  ;;  %v586_v61 = vadd.f32 %v554_v53, %v386_v30 }
 0x128   : > { %v642_v3 = vpop.permute.xlu1 %641  ;;  %v654_v26 = vpop.permute.xlu0 %653 }
 0x129   : > { %v747_v58 = vmul.f32 %v2683_v28, %v642_v3  ;;  %v750_v0 = vmul.f32 %v2683_v28, %v654_v26  ;;  %v585_v8 = vadd.f32 %v553_v33, %v385_v52 }
 0x12b   : > { %v2752_v22 = vadd.f32 %v747_v58, %v579_v62  ;;  %v2754_v37 = vadd.f32 %v750_v0, %v582_v34  ;;  %v388_v62 = vmul.f32 %v2480_v63, %v2449_v54 }
 0x12c   : > { %v650_v42 = vpop.permute.xlu1 %649  ;;  %v662_v9 = vpop.permute.xlu0 %661 }
 0x12d   : > { %v749_v12 = vmul.f32 %v2683_v28, %v650_v42  ;;  %v752_v45 = vmul.f32 %v2683_v28, %v662_v9  ;;  %v588_v7 = vadd.f32 %v556_v5, %v388_v62  ;;  %v538_v62 = vmul.f32 %v2613_v14, %v2534_v55  ;;  %v2844_v55 = vld [vmem:[%s3611_s1 + $0x3] ss:$0 sm:$0xff] }
 0x12f   : > { %v2766_v18 = vadd.f32 %v749_v12, %v581_v1  ;;  %v2768_v38 = vadd.f32 %v752_v45, %v584_v2 }
 0x130   : > { %v658_v27 = vpop.permute.xlu1 %657  ;;  %v670_v11 = vpop.permute.xlu0 %669 }
 0x131   : > { %v751_v46 = vmul.f32 %v2683_v28, %v658_v27  ;;  %v754_v47 = vmul.f32 %v2683_v28, %v670_v11 }
 0x133   : > { %v2780_v4 = vadd.f32 %v751_v46, %v583_v6  ;;  %v2782_v3 = vadd.f32 %v754_v47, %v586_v61 }
 0x134   : > { %v666_v26 = vpop.permute.xlu1 %665  ;;  %v678_v34 = vpop.permute.xlu0 %677 }
 0x135   : > { %3626 = vst [vmem:[#allocation15_spill] sm:$0xff] %v2782_v3  ;;  %v753_v58 = vmul.f32 %v2683_v28, %v666_v26  ;;  %v756_v0 = vmul.f32 %v2683_v28, %v678_v34 }
 0x137   : > { %v2790_v43 = vadd.f32 %v753_v58, %v585_v8  ;;  %v2792_v54 = vadd.f32 %v756_v0, %v588_v7  ;;  %v370_v7 = vmul.f32 %v2480_v63, %v3634_v13  ;;  %v738_v58 = vmul.f32 %v2683_v28, %v2689_v60  ;;  %v3638_v60 = vld [vmem:[#allocation4_spill] sm:$0xff]  ;;  %v2874_v13 = vld [vmem:[%s3612_s2 + $0x1] ss:$0 sm:$0xff] }
 0x138   : > { %v674_v48 = vpop.permute.xlu1 %673  ;;  %v686_v1 = vpop.permute.xlu0 %685 }
 0x139   : > { %3627 = vst [vmem:[#allocation16_spill] sm:$0xff] %v2792_v54  ;;  %v755_v42 = vmul.f32 %v2683_v28, %v674_v48  ;;  %v758_v9 = vmul.f32 %v2683_v28, %v686_v1  ;;  %v570_v0 = vadd.f32 %v538_v62, %v370_v7  ;;  %v541_v48 = vmul.f32 %v2613_v14, %v3637_v49 }
 0x13b   : > { %v2796_v10 = vadd.f32 %v755_v42, %v587_v25  ;;  %v2799_v2 = vadd.f32 %v758_v9, %v2620_v35  ;;  %v770_v9 = vadd.f32 %v738_v58, %v570_v0  ;;  %v3643_v0 = vld [vmem:[#allocation12_spill] sm:$0xff] }
 0x13c   : > { %v2801_v53 = vpop.permute.xlu1 %681  ;;  %v694_v12 = vpop.permute.xlu0 %693  ;;  %v545_v49 = vmul.f32 %v2613_v14, %v3643_v0 }
 0x13d   : > { %3628 = vst [vmem:[#allocation17_spill] sm:$0xff] %v2799_v2  ;;  %v760_v51 = vmul.f32 %v2683_v28, %v694_v12 }
 0x13f   : > { %v2805_v45 = vadd.f32 %v760_v51, %v2629_v17 }
 0x140   : > { %v2807_v50 = vpop.permute.xlu1 %689  ;;  %v702_v30 = vpop.permute.xlu0 %701 }
 0x141   : > { %3629 = vst [vmem:[#allocation18_spill] sm:$0xff] %v2805_v45  ;;  %v762_v6 = vmul.f32 %v2683_v28, %v702_v30 }
 0x143   : > { %v2811_v33 = vadd.f32 %v762_v6, %v2639_v19  ;;  %v3640_v6 = vld [vmem:[#allocation11_spill] sm:$0xff] }
 0x144   : > { %v2813_v27 = vpop.permute.xlu1 %697  ;;  %v710_v35 = vpop.permute.xlu0 %709 }
 0x145   : > { %3630 = vst [vmem:[#allocation19_spill] sm:$0xff] %v2811_v33  ;;  %v764_v11 = vmul.f32 %v2683_v28, %v710_v35  ;;  %v543_v35 = vmul.f32 %v2613_v14, %v3640_v6  ;;  %v745_v6 = vmul.f32 %v2683_v28, %v2731_v44 }
 0x147   : > { %v2817_v61 = vadd.f32 %v764_v11, %v2651_v56 }
 0x148   : > { %v706_v5 = vpop.permute.xlu1 %705  ;;  %v718_v46 = vpop.permute.xlu0 %717 }
 0x149   : > { %3631 = vst [vmem:[#allocation20_spill] sm:$0xff] %v2817_v61  ;;  %v763_v17 = vmul.f32 %v2683_v28, %v706_v5  ;;  %v766_v47 = vmul.f32 %v2683_v28, %v718_v46 }
 0x14b   : > { %v2822_v52 = vadd.f32 %v763_v17, %v2641_v41  ;;  %v2825_v19 = vadd.f32 %v766_v47, %v2662_v23  ;;  %v3641_v47 = vld [vmem:[#allocation5_spill] sm:$0xff] }
 0x14c   : > { %v714_v8 = vpop.permute.xlu1 %713  ;;  %v726_v26 = vpop.permute.xlu0 %725  ;;  %v375_v62 = vmul.f32 %v2480_v63, %v3641_v47 }
 0x14d   : > { %3632 = vst [vmem:[#allocation21_spill] sm:$0xff] %v2822_v52  ;;  %3633 = vst [vmem:[#allocation22_spill] sm:$0xff] %v2825_v19  ;;  %v765_v56 = vmul.f32 %v2683_v28, %v714_v8  ;;  %v768_v34 = vmul.f32 %v2683_v28, %v726_v26  ;;  %v1091_v26 = vld [vmem:[#allocation2] sm:$0xff]  ;;  %v2997_v19 = vld [vmem:[%s3612_s2 + $0x8] ss:$0 sm:$0xff] }
 0x14f   : > { %v2836_v41 = vadd.f32 %v765_v56, %v2653_v15  ;;  %v2839_v23 = vadd.f32 %v768_v34, %v2675_v36  ;;  %v373_v15 = vmul.f32 %v2480_v63, %v3638_v60  ;;  %v741_v36 = vmul.f32 %v2683_v28, %v2711_v40  ;;  %v1194_v34 = vld [vmem:[#allocation2 + $0x1] sm:$0xff] }
 0x150   : > { %v722_v1 = vpop.permute.xlu1 %721  ;;  %v743_v40 = vmul.f32 %v2683_v28, %v2720_v57  ;;  %v575_v57 = vadd.f32 %v543_v35, %v375_v62  ;;  %v1298_v35 = vld [vmem:[#allocation2 + $0x2] sm:$0xff] }
 0x151   : > { %3635 = vst [vmem:[#allocation3_spill] sm:$0xff] %v2836_v41  ;;  %3636 = vst [vmem:[#allocation23_spill] sm:$0xff] %v2839_v23  ;;  %v767_v25 = vmul.f32 %v2683_v28, %v722_v1  ;;  %v806_v42 = vpop.permute.xlu0 %805  ;;  %v573_v30 = vadd.f32 %v541_v48, %v373_v15  ;;  %v1092_v1 = vld [vmem:[#allocation2 + $0x8] sm:$0xff] }
 0x152   : > { %v938_v12 = vmul.f32 %v2844_v55, %v806_v42  ;;  %v775_v15 = vadd.f32 %v743_v40, %v575_v57  ;;  %v2904_v57 = vld [vmem:[%s3612_s2 + $0x3] ss:$0 sm:$0xff] }
 0x153   : > { %v2855_v51 = vadd.f32 %v767_v25, %v2664_v16  ;;  %v773_v8 = vadd.f32 %v741_v36, %v573_v30  ;;  %v2867_v16 = vld [vmem:[%s3612_s2] ss:$0 sm:$0xff]  ;;  %v1195_v25 = vld [vmem:[#allocation2 + $0x9] sm:$0xff] }
 0x154   : > { %v970_v11 = vadd.f32 %v938_v12, %v770_v9  ;;  %v730_v5 = vpop.permute.xlu1 %729  ;;  %v1130_v48 = vmul.f32 %v2867_v16, %v1091_v26  ;;  %v1234_v9 = vmul.f32 %v2874_v13, %v1194_v34  ;;  %v3644_v12 = vld [vmem:[#allocation6_spill] sm:$0xff] }
 0x155   : > { %3639 = vst [vmem:[#allocation10_spill] sm:$0xff] %v2855_v51  ;;  %v769_v46 = vmul.f32 %v2683_v28, %v730_v5  ;;  %v818_v17 = vpop.permute.xlu0 %817  ;;  %v377_v30 = vmul.f32 %v2480_v63, %v3644_v12  ;;  %v1131_v5 = vmul.f32 %v2867_v16, %v1092_v1  ;;  %v3646_v1 = vld [vmem:[#allocation14_spill] sm:$0xff]  ;;  %v3647_v12 = vld [vmem:[#allocation7_spill] sm:$0xff] }
 0x156   : > { %1059 = vst.msk [vmem:[#allocation2 + $0x19] sm:$0xff] %vm1002_vm0, %v970_v11  ;;  %v941_v56 = vmul.f32 %v2844_v55, %v818_v17  ;;  %v2893_v11 = vld [vmem:[%s3612_s2 + $0x2] ss:$0 sm:$0xff] }
 0x157   : > { %v2877_v7 = vadd.f32 %v769_v46, %v2677_v59  ;;  %v1235_v46 = vmul.f32 %v2874_v13, %v1195_v25  ;;  %v577_v62 = vadd.f32 %v545_v49, %v377_v30  ;;  %v1338_v44 = vmul.f32 %v2893_v11, %v1298_v35  ;;  %v3645_v49 = vld [vmem:[#allocation13_spill] sm:$0xff] }
 0x158   : > { %v973_v58 = vadd.f32 %v941_v56, %v773_v8  ;;  %v1299_v8 = vld [vmem:[#allocation2 + $0xa] sm:$0xff]  ;;  %v1266_v56 = vadd.f32 %v1234_v9, %v1130_v48  ;;  %v557_v48 = vmul.f32 %v2613_v14, %v3645_v49  ;;  %v559_v25 = vmul.f32 %v2613_v14, %v3646_v1 }
 0x159   : > { %3642 = vst [vmem:[#allocation4_spill] sm:$0xff] %v2877_v7  ;;  %v810_v42 = vpop.permute.xlu1 %809  ;;  %v826_v60 = vpop.permute.xlu0 %825  ;;  %v777_v34 = vadd.f32 %v745_v6, %v577_v62  ;;  %v389_v30 = vmul.f32 %v2480_v63, %v3647_v12  ;;  %v3648_v6 = vld [vmem:[#allocation8_spill] sm:$0xff]  ;;  %v2957_v12 = vld [vmem:[%s3612_s2 + $0x5] ss:$0 sm:$0xff] }
 0x15a   : > { %1062 = vst.msk [vmem:[#allocation2 + $0x39] sm:$0xff] %vm1002_vm0, %v973_v58  ;;  %v939_v36 = vmul.f32 %v2844_v55, %v810_v42  ;;  %v943_v59 = vmul.f32 %v2844_v55, %v826_v60  ;;  %v1267_v42 = vadd.f32 %v1235_v46, %v1131_v5  ;;  %v1339_v60 = vmul.f32 %v2893_v11, %v1299_v8  ;;  %v3649_v8 = vld [vmem:[#allocation9_spill] sm:$0xff] }
 0x15b   : > { %v391_v35 = vmul.f32 %v2480_v63, %v3648_v6  ;;  %v561_v5 = vmul.f32 %v2613_v14, %v2624_v21  ;;  %v759_v21 = vmul.f32 %v2683_v28, %v2807_v50 }
 0x15c   : > { %v971_v17 = vadd.f32 %v939_v36, %v2699_v24  ;;  %v975_v47 = vadd.f32 %v943_v59, %v775_v15  ;;  %v1371_v14 = vadd.f32 %v1339_v60, %v1267_v42 }
 0x15d   : > { %v814_v40 = vpop.permute.xlu1 %813  ;;  %v834_v26 = vpop.permute.xlu0 %833  ;;  %v1093_v58 = vld [vmem:[#allocation2 + $0x18] sm:$0xff] }
 0x15e   : > { %1060 = vst.msk [vmem:[#allocation2 + $0x21] sm:$0xff] %vm1002_vm0, %v971_v17  ;;  %1064 = vst.msk [vmem:[#allocation2 + $0x51] sm:$0xff] %vm1002_vm0, %v975_v47  ;;  %v940_v24 = vmul.f32 %v2844_v55, %v814_v40  ;;  %v945_v0 = vmul.f32 %v2844_v55, %v834_v26  ;;  %v1370_v17 = vadd.f32 %v1338_v44, %v1266_v56  ;;  %v1196_v47 = vld [vmem:[#allocation2 + $0x19] sm:$0xff]  ;;  %v2933_v44 = vld [vmem:[%s3612_s2 + $0x4] ss:$0 sm:$0xff] }
 0x15f   : > { %v1442_v62 = vmul.f32 %v2904_v57, %v1093_v58  ;;  %v393_v40 = vmul.f32 %v2480_v63, %v3649_v8  ;;  %v589_v26 = vadd.f32 %v557_v48, %v389_v30  ;;  %v591_v56 = vadd.f32 %v559_v25, %v391_v35 }
 0x160   : > { %v972_v15 = vadd.f32 %v940_v24, %v2707_v32  ;;  %v977_v9 = vadd.f32 %v945_v0, %v777_v34  ;;  %v757_v32 = vmul.f32 %v2683_v28, %v2801_v53  ;;  %v1132_v53 = vmul.f32 %v2867_v16, %v1093_v58 }
 0x161   : > { %v822_v36 = vpop.permute.xlu1 %821  ;;  %v2914_v59 = vpop.permute.xlu0 %841  ;;  %v1236_v34 = vmul.f32 %v2874_v13, %v1196_v47  ;;  %v1474_v25 = vadd.f32 %v1442_v62, %v1370_v17  ;;  %v2947_v58 = vadd.f32 %v561_v5, %v393_v40  ;;  %v2961_v62 = vadd.f32 %v759_v21, %v591_v56 }
 0x162   : > { %1061 = vst.msk [vmem:[#allocation2 + $0x31] sm:$0xff] %vm1002_vm0, %v972_v15  ;;  %1066 = vst.msk [vmem:[#allocation2 + $0x69] sm:$0xff] %vm1002_vm0, %v977_v9  ;;  %v942_v46 = vmul.f32 %v2844_v55, %v822_v36  ;;  %v2949_v9 = vadd.f32 %v757_v32, %v589_v26  ;;  %v1546_v36 = vmul.f32 %v2933_v44, %v1196_v47  ;;  %v1199_v32 = vld [vmem:[#allocation2 + $0x39] sm:$0xff] }
 0x163   : > { %3650 = vst [vmem:[#allocation11_spill] sm:$0xff] %v2961_v62  ;;  %v2965_v47 = vmul.f32 %v2683_v28, %v2813_v27  ;;  %v1268_v5 = vadd.f32 %v1236_v34, %v1132_v53  ;;  %v2976_v28 = vld [vmem:[%s3612_s2 + $0x6] ss:$0 sm:$0xff] }
 0x164   : > { %v974_v63 = vadd.f32 %v942_v46, %v2709_v29  ;;  %v1303_v46 = vld [vmem:[#allocation2 + $0x3a] sm:$0xff] }
 0x165   : > { %v1094_v24 = vld [vmem:[#allocation2 + $0x20] sm:$0xff]  ;;  %v2940_v48 = vpop.permute.xlu1 %829  ;;  %v2942_v1 = vpop.permute.xlu0 %849 }
 0x166   : > { %v1197_v0 = vld [vmem:[#allocation2 + $0x21] sm:$0xff]  ;;  %v1133_v15 = vmul.f32 %v2867_v16, %v1094_v24  ;;  %v1443_v50 = vmul.f32 %v2904_v57, %v1094_v24  ;;  %1063 = vst.msk [vmem:[#allocation2 + $0x49] sm:$0xff] %vm1002_vm0, %v974_v63  ;;  %v1578_v24 = vadd.f32 %v1546_v36, %v1474_v25  ;;  %v1239_v25 = vmul.f32 %v2874_v13, %v1199_v32 }
 0x167   : > { %v1300_v49 = vld [vmem:[#allocation2 + $0x1a] sm:$0xff]  ;;  %v1237_v42 = vmul.f32 %v2874_v13, %v1197_v0  ;;  %v1301_v60 = vld [vmem:[#allocation2 + $0x22] sm:$0xff]  ;;  %v1547_v17 = vmul.f32 %v2933_v44, %v1197_v0 }
 0x168   : > { %v1340_v29 = vmul.f32 %v2893_v11, %v1300_v49  ;;  %v1341_v6 = vmul.f32 %v2893_v11, %v1301_v60  ;;  %v1475_v35 = vadd.f32 %v1443_v50, %v1371_v14  ;;  %v1650_v8 = vmul.f32 %v2957_v12, %v1300_v49  ;;  %v2984_v49 = vld [vmem:[%s3612_s2 + $0x7] ss:$0 sm:$0xff] }
 0x169   : > { %v1269_v30 = vadd.f32 %v1237_v42, %v1133_v15  ;;  %v2968_v40 = vpop.permute.xlu1 %837  ;;  %v2970_v26 = vpop.permute.xlu0 %857  ;;  %v1651_v0 = vmul.f32 %v2957_v12, %v1301_v60  ;;  %v1095_v56 = vld [vmem:[#allocation2 + $0x30] sm:$0xff]  ;;  %v1096_v21 = vld [vmem:[#allocation2 + $0x38] sm:$0xff]  ;;  %v1343_v60 = vmul.f32 %v2893_v11, %v1303_v46 }
 0x16a   : > { %v1579_v14 = vadd.f32 %v1547_v17, %v1475_v35  ;;  %v1198_v15 = vld [vmem:[#allocation2 + $0x31] sm:$0xff]  ;;  %v1372_v42 = vadd.f32 %v1340_v29, %v1268_v5  ;;  %v1134_v27 = vmul.f32 %v2867_v16, %v1095_v56  ;;  %v1444_v34 = vmul.f32 %v2904_v57, %v1095_v56 }
 0x16b   : > { %v1373_v63 = vadd.f32 %v1341_v6, %v1269_v30  ;;  %v1238_v53 = vmul.f32 %v2874_v13, %v1198_v15  ;;  %v1302_v36 = vld [vmem:[#allocation2 + $0x32] sm:$0xff]  ;;  %v1445_v29 = vmul.f32 %v2904_v57, %v1096_v21  ;;  %v1682_v30 = vadd.f32 %v1650_v8, %v1578_v24 }
 0x16c   : > { %v1683_v50 = vadd.f32 %v1651_v0, %v1579_v14  ;;  %v1135_v6 = vmul.f32 %v2867_v16, %v1096_v21  ;;  %v1476_v17 = vadd.f32 %v1444_v34, %v1372_v42  ;;  %v1548_v14 = vmul.f32 %v2933_v44, %v1198_v15 }
 0x16d   : > { %v1270_v35 = vadd.f32 %v1238_v53, %v1134_v27  ;;  %v2990_v5 = vpop.permute.xlu1 %845  ;;  %v2992_v23 = vpop.permute.xlu0 %865  ;;  %v1477_v7 = vadd.f32 %v1445_v29, %v1373_v63  ;;  %v1755_v0 = vmul.f32 %v2976_v28, %v1095_v56  ;;  %v1756_v8 = vmul.f32 %v2976_v28, %v1096_v21  ;;  %v1097_v29 = vld [vmem:[#allocation2 + $0x48] sm:$0xff]  ;;  %v1098_v33 = vld [vmem:[#allocation2 + $0x50] sm:$0xff] }
 0x16e   : > { %v1549_v24 = vmul.f32 %v2933_v44, %v1199_v32  ;;  %v1653_v42 = vmul.f32 %v2957_v12, %v1303_v46  ;;  %v1860_v27 = vmul.f32 %v2984_v49, %v1199_v32  ;;  %v1342_v53 = vmul.f32 %v2893_v11, %v1302_v36  ;;  %v1200_v41 = vld [vmem:[#allocation2 + $0x49] sm:$0xff]  ;;  %v1201_v32 = vld [vmem:[#allocation2 + $0x51] sm:$0xff] }
 0x16f   : > { %v1580_v34 = vadd.f32 %v1548_v14, %v1476_v17  ;;  %v1787_v61 = vadd.f32 %v1755_v0, %v1682_v30  ;;  %v1788_v51 = vadd.f32 %v1756_v8, %v1683_v50  ;;  %v1859_v63 = vmul.f32 %v2984_v49, %v1198_v15 }
 0x170   : > { %v1964_v56 = vmul.f32 %v2997_v19, %v1303_v46  ;;  %v1271_v21 = vadd.f32 %v1239_v25, %v1135_v6  ;;  %v1374_v45 = vadd.f32 %v1342_v53, %v1270_v35  ;;  %v1652_v52 = vmul.f32 %v2957_v12, %v1302_v36 }
 0x171   : > { %v854_v2 = vpop.permute.xlu1 %853  ;;  %v874_v54 = vpop.permute.xlu0 %873  ;;  %v1581_v62 = vadd.f32 %v1549_v24, %v1477_v7  ;;  %v1891_v3 = vadd.f32 %v1859_v63, %v1787_v61  ;;  %v1892_v17 = vadd.f32 %v1860_v27, %v1788_v51  ;;  %v1963_v50 = vmul.f32 %v2997_v19, %v1302_v36  ;;  %v3022_v51 = vld [vmem:[#allocation2 + $0x52] sm:$0xff] }
 0x172   : > { %v1136_v46 = vmul.f32 %v2867_v16, %v1097_v29  ;;  %v1137_v15 = vmul.f32 %v2867_v16, %v1098_v33  ;;  %v1240_v25 = vmul.f32 %v2874_v13, %v1200_v41  ;;  %v947_v61 = vmul.f32 %v2844_v55, %v2914_v59 }
 0x173   : > { %v1684_v7 = vadd.f32 %v1652_v52, %v1580_v34  ;;  %v1995_v36 = vadd.f32 %v1963_v50, %v1891_v3  ;;  %v1996_v30 = vadd.f32 %v1964_v56, %v1892_v17  ;;  %v1446_v6 = vmul.f32 %v2904_v57, %v1097_v29  ;;  %v1304_v56 = vld [vmem:[#allocation2 + $0x4a] sm:$0xff] }
 0x174   : > { %v1241_v35 = vmul.f32 %v2874_v13, %v1201_v32  ;;  %v3027_v14 = vmul.f32 %v2933_v44, %v1201_v32  ;;  %v1375_v0 = vadd.f32 %v1343_v60, %v1271_v21  ;;  %v1447_v8 = vmul.f32 %v2904_v57, %v1098_v33 }
 0x175   : > { %v862_v24 = vpop.permute.xlu1 %861  ;;  %v882_v27 = vpop.permute.xlu0 %881  ;;  %v1862_v53 = vmul.f32 %v2984_v49, %v1201_v32  ;;  %2027 = vst.msk [vmem:[%s3015_s22] sm:$0xff] %vm1002_vm0, %v1995_v36  ;;  %2028 = vst.msk [vmem:[%s3015_s22 + $0x8] sm:$0xff] %vm1002_vm0, %v1996_v30  ;;  %v1478_v3 = vadd.f32 %v1446_v6, %v1374_v45  ;;  %v1685_v52 = vadd.f32 %v1653_v42, %v1581_v62 }
 0x176   : > { %v1757_v59 = vmul.f32 %v2976_v28, %v1097_v29  ;;  %v1966_v34 = vmul.f32 %v2997_v19, %v3022_v51  ;;  %v3038_v63 = vadd.f32 %v1240_v25, %v1136_v46  ;;  %v3040_v60 = vadd.f32 %v1241_v35, %v1137_v15 }
 0x177   : > { %v1758_v21 = vmul.f32 %v2976_v28, %v1098_v33  ;;  %v1550_v32 = vmul.f32 %v2933_v44, %v1200_v41  ;;  %v1861_v50 = vmul.f32 %v2984_v49, %v1200_v41  ;;  %v979_v45 = vadd.f32 %v947_v61, %v2752_v22 }
 0x178   : > { %v1789_v17 = vadd.f32 %v1757_v59, %v1684_v7  ;;  %v1479_v62 = vadd.f32 %v1447_v8, %v1375_v0  ;;  %v944_v29 = vmul.f32 %v2844_v55, %v2940_v48  ;;  %v949_v46 = vmul.f32 %v2844_v55, %v2942_v1  ;;  %v3651_v59 = vld [vmem:[#allocation15_spill] sm:$0xff] }
 0x179   : > { %v1790_v42 = vadd.f32 %v1758_v21, %v1685_v52  ;;  %v870_v15 = vpop.permute.xlu1 %869  ;;  %v890_v25 = vpop.permute.xlu0 %889  ;;  %v1582_v36 = vadd.f32 %v1550_v32, %v1478_v3  ;;  %v1965_v33 = vmul.f32 %v2997_v19, %v1304_v56  ;;  %1068 = vst.msk [vmem:[#allocation2 + $0x81] sm:$0xff] %vm1002_vm0, %v979_v45  ;;  %v946_v41 = vmul.f32 %v2844_v55, %v2968_v40  ;;  %v3652_v21 = vld [vmem:[#allocation11_spill] sm:$0xff]  ;;  %v3653_v45 = vld [vmem:[#allocation16_spill] sm:$0xff] }
 0x17a   : > { %v1893_v30 = vadd.f32 %v1861_v50, %v1789_v17  ;;  %v976_v61 = vadd.f32 %v944_v29, %v2718_v31  ;;  %v981_v48 = vadd.f32 %v949_v46, %v2766_v18  ;;  %v951_v1 = vmul.f32 %v2844_v55, %v2970_v26 }
 0x17b   : > { %v1894_v22 = vadd.f32 %v1862_v53, %v1790_v42  ;;  %v978_v6 = vadd.f32 %v946_v41, %v2727_v39  ;;  %v948_v35 = vmul.f32 %v2844_v55, %v2990_v5  ;;  %v953_v0 = vmul.f32 %v2844_v55, %v2992_v23 }
 0x17c   : > { %v1997_v7 = vadd.f32 %v1965_v33, %v1893_v30  ;;  %1065 = vst.msk [vmem:[#allocation2 + $0x61] sm:$0xff] %vm1002_vm0, %v976_v61  ;;  %1070 = vst.msk [vmem:[#allocation2 + $0x99] sm:$0xff] %vm1002_vm0, %v981_v48  ;;  %v983_v31 = vadd.f32 %v951_v1, %v2780_v4  ;;  %v950_v18 = vmul.f32 %v2844_v55, %v854_v2 }
 0x17d   : > { %v1998_v40 = vadd.f32 %v1966_v34, %v1894_v22  ;;  %v955_v26 = vmul.f32 %v2844_v55, %v874_v54  ;;  %v878_v8 = vpop.permute.xlu1 %877  ;;  %v898_v39 = vpop.permute.xlu0 %897  ;;  %1067 = vst.msk [vmem:[#allocation2 + $0x79] sm:$0xff] %vm1002_vm0, %v978_v6  ;;  %v980_v5 = vadd.f32 %v948_v35, %v2740_v20  ;;  %v985_v23 = vadd.f32 %v953_v0, %v2790_v43 }
 0x17e   : > { %2029 = vst.msk [vmem:[%s3015_s22 + $0x10] sm:$0xff] %vm1002_vm0, %v1997_v7  ;;  %v952_v53 = vmul.f32 %v2844_v55, %v862_v24  ;;  %v957_v3 = vmul.f32 %v2844_v55, %v882_v27  ;;  %1072 = vst.msk [vmem:[#allocation2 + $0xb1] sm:$0xff] %vm1002_vm0, %v983_v31  ;;  %v982_v4 = vadd.f32 %v950_v18, %v2754_v37 }
 0x17f   : > { %2030 = vst.msk [vmem:[%s3015_s22 + $0x18] sm:$0xff] %vm1002_vm0, %v1998_v40  ;;  %v987_v54 = vadd.f32 %v955_v26, %v2796_v10  ;;  %v954_v2 = vmul.f32 %v2844_v55, %v870_v15  ;;  %v959_v52 = vmul.f32 %v2844_v55, %v890_v25  ;;  %1069 = vst.msk [vmem:[#allocation2 + $0x91] sm:$0xff] %vm1002_vm0, %v980_v5 }
 0x180   : > { %1074 = vst.msk [vmem:[#allocation2 + $0xc9] sm:$0xff] %vm1002_vm0, %v985_v23  ;;  %v984_v20 = vadd.f32 %v952_v53, %v2768_v38  ;;  %v989_v43 = vadd.f32 %v957_v3, %v2949_v9  ;;  %v956_v24 = vmul.f32 %v2844_v55, %v878_v8  ;;  %v961_v27 = vmul.f32 %v2844_v55, %v898_v39  ;;  %v1205_v35 = vld [vmem:[#allocation2 + $0x81] sm:$0xff] }
 0x181   : > { %v793_v37 = vadd.f32 %v2965_v47, %v2947_v58  ;;  %v1344_v10 = vmul.f32 %v2893_v11, %v1304_v56  ;;  %1071 = vst.msk [vmem:[#allocation2 + $0xa9] sm:$0xff] %vm1002_vm0, %v982_v4  ;;  %1076 = vst.msk [vmem:[#allocation2 + $0xe1] sm:$0xff] %vm1002_vm0, %v987_v54  ;;  %v986_v34 = vadd.f32 %v954_v2, %v3651_v59  ;;  %v1203_v58 = vld [vmem:[#allocation2 + $0x69] sm:$0xff] }
 0x182   : > { %v991_v32 = vadd.f32 %v959_v52, %v3652_v21  ;;  %v1345_v38 = vmul.f32 %v2893_v11, %v3022_v51  ;;  %v1583_v9 = vadd.f32 %v3027_v14, %v1479_v62  ;;  %v1654_v17 = vmul.f32 %v2957_v12, %v1304_v56  ;;  %1073 = vst.msk [vmem:[#allocation2 + $0xc1] sm:$0xff] %vm1002_vm0, %v984_v20  ;;  %v1307_v47 = vld [vmem:[#allocation2 + $0x6a] sm:$0xff] }
 0x183   : > { %1078 = vst.msk [vmem:[#allocation2 + $0xf9] sm:$0xff] %vm1002_vm0, %v989_v43  ;;  %v1376_v50 = vadd.f32 %v1344_v10, %v3038_v63  ;;  %1075 = vst.msk [vmem:[#allocation2 + $0xd9] sm:$0xff] %vm1002_vm0, %v986_v34  ;;  %v988_v42 = vadd.f32 %v956_v24, %v3653_v45  ;;  %v993_v29 = vadd.f32 %v961_v27, %v793_v37  ;;  %v1099_v56 = vld [vmem:[#allocation2 + $0x60] sm:$0xff]  ;;  %v1100_v46 = vld [vmem:[#allocation2 + $0x68] sm:$0xff] }
 0x184   : > { %1080 = vst.msk [vmem:[#allocation2 + $0x111] sm:$0xff] %vm1002_vm0, %v991_v32  ;;  %v1655_v14 = vmul.f32 %v2957_v12, %v3022_v51  ;;  %v1686_v62 = vadd.f32 %v1654_v17, %v1582_v36  ;;  %v1202_v15 = vld [vmem:[#allocation2 + $0x61] sm:$0xff]  ;;  %v1377_v25 = vadd.f32 %v1345_v38, %v3040_v60  ;;  %v1138_v30 = vmul.f32 %v2867_v16, %v1099_v56  ;;  %v1101_v23 = vld [vmem:[#allocation2 + $0x78] sm:$0xff] }
 0x185   : > { %v1139_v63 = vmul.f32 %v2867_v16, %v1100_v46  ;;  %v1242_v33 = vmul.f32 %v2874_v13, %v1202_v15  ;;  %v1448_v41 = vmul.f32 %v2904_v57, %v1099_v56  ;;  %1077 = vst.msk [vmem:[#allocation2 + $0xf1] sm:$0xff] %vm1002_vm0, %v988_v42  ;;  %1082 = vst.msk [vmem:[#allocation2 + $0x129] sm:$0xff] %vm1002_vm0, %v993_v29  ;;  %v1306_v1 = vld [vmem:[#allocation2 + $0x62] sm:$0xff]  ;;  %v1204_v52 = vld [vmem:[#allocation2 + $0x79] sm:$0xff] }
 0x186   : > { %v1243_v51 = vmul.f32 %v2874_v13, %v1203_v58  ;;  %v1347_v36 = vmul.f32 %v2893_v11, %v1307_v47  ;;  %v1449_v22 = vmul.f32 %v2904_v57, %v1100_v46  ;;  %v1687_v61 = vadd.f32 %v1655_v14, %v1583_v9  ;;  %v1102_v2 = vld [vmem:[#allocation2 + $0x80] sm:$0xff] }
 0x187   : > { %v1553_v60 = vmul.f32 %v2933_v44, %v1203_v58  ;;  %v1657_v48 = vmul.f32 %v2957_v12, %v1307_v47  ;;  %v1480_v7 = vadd.f32 %v1448_v41, %v1376_v50  ;;  %v1759_v6 = vmul.f32 %v2976_v28, %v1099_v56  ;;  %v1309_v37 = vld [vmem:[#allocation2 + $0x82] sm:$0xff]  ;;  %v1308_v50 = vld [vmem:[#allocation2 + $0x7a] sm:$0xff] }
 0x188   : > { %v1274_v0 = vadd.f32 %v1242_v33, %v1138_v30  ;;  %v1481_v40 = vadd.f32 %v1449_v22, %v1377_v25  ;;  %v1552_v31 = vmul.f32 %v2933_v44, %v1202_v15  ;;  %v1760_v18 = vmul.f32 %v2976_v28, %v1100_v46 }
 0x189   : > { %v1864_v26 = vmul.f32 %v2984_v49, %v1203_v58  ;;  %v1275_v8 = vadd.f32 %v1243_v51, %v1139_v63  ;;  %v1791_v39 = vadd.f32 %v1759_v6, %v1686_v62  ;;  %v1863_v5 = vmul.f32 %v2984_v49, %v1202_v15 }
 0x18a   : > { %v1968_v53 = vmul.f32 %v2997_v19, %v1307_v47  ;;  %v1346_v3 = vmul.f32 %v2893_v11, %v1306_v1  ;;  %v1584_v4 = vadd.f32 %v1552_v31, %v1480_v7  ;;  %v1792_v54 = vadd.f32 %v1760_v18, %v1687_v61  ;;  %v1206_v7 = vld [vmem:[#allocation2 + $0x91] sm:$0xff]  ;;  %v1207_v18 = vld [vmem:[#allocation2 + $0x99] sm:$0xff] }
 0x18b   : > { %v1245_v20 = vmul.f32 %v2874_v13, %v1205_v35  ;;  %v1585_v43 = vadd.f32 %v1553_v60, %v1481_v40  ;;  %v1895_v24 = vadd.f32 %v1863_v5, %v1791_v39  ;;  %v1967_v27 = vmul.f32 %v2997_v19, %v1306_v1 }
 0x18c   : > { %v1378_v10 = vadd.f32 %v1346_v3, %v1274_v0  ;;  %v1656_v59 = vmul.f32 %v2957_v12, %v1306_v1  ;;  %v1896_v34 = vadd.f32 %v1864_v26, %v1792_v54  ;;  %v1140_v21 = vmul.f32 %v2867_v16, %v1101_v23  ;;  %v1104_v1 = vld [vmem:[#allocation2 + $0x98] sm:$0xff] }
 0x18d   : > { %v1999_v32 = vadd.f32 %v1967_v27, %v1895_v24  ;;  %v1141_v38 = vmul.f32 %v2867_v16, %v1102_v2  ;;  %v1244_v9 = vmul.f32 %v2874_v13, %v1204_v52  ;;  %v1379_v17 = vadd.f32 %v1347_v36, %v1275_v8 }
 0x18e   : > { %v1688_v58 = vadd.f32 %v1656_v59, %v1584_v4  ;;  %v2000_v47 = vadd.f32 %v1968_v53, %v1896_v34  ;;  %v1450_v45 = vmul.f32 %v2904_v57, %v1101_v23  ;;  %v1451_v42 = vmul.f32 %v2904_v57, %v1102_v2  ;;  %v1310_v59 = vld [vmem:[#allocation2 + $0x92] sm:$0xff] }
 0x18f   : > { %v1349_v29 = vmul.f32 %v2893_v11, %v1309_v37  ;;  %2031 = vst.msk [vmem:[%s3015_s22 + $0x20] sm:$0xff] %vm1002_vm0, %v1999_v32  ;;  %v1276_v14 = vadd.f32 %v1244_v9, %v1140_v21  ;;  %v1554_v62 = vmul.f32 %v2933_v44, %v1204_v52  ;;  %v1689_v56 = vadd.f32 %v1657_v48, %v1585_v43  ;;  %v1103_v48 = vld [vmem:[#allocation2 + $0x90] sm:$0xff] }
 0x190   : > { %2032 = vst.msk [vmem:[%s3015_s22 + $0x28] sm:$0xff] %vm1002_vm0, %v2000_v47  ;;  %v1482_v46 = vadd.f32 %v1450_v45, %v1378_v10  ;;  %v1483_v15 = vadd.f32 %v1451_v42, %v1379_v17  ;;  %v1761_v25 = vmul.f32 %v2976_v28, %v1101_v23  ;;  %v1762_v30 = vmul.f32 %v2976_v28, %v1102_v2 }
 0x191   : > { %v1555_v63 = vmul.f32 %v2933_v44, %v1205_v35  ;;  %v1866_v33 = vmul.f32 %v2984_v49, %v1205_v35  ;;  %v1277_v41 = vadd.f32 %v1245_v20, %v1141_v38  ;;  %v1348_v51 = vmul.f32 %v2893_v11, %v1308_v50  ;;  %v1311_v35 = vld [vmem:[#allocation2 + $0x9a] sm:$0xff]  ;;  %v1209_v38 = vld [vmem:[#allocation2 + $0xb1] sm:$0xff] }
 0x192   : > { %v1586_v36 = vadd.f32 %v1554_v62, %v1482_v46  ;;  %v1793_v22 = vadd.f32 %v1761_v25, %v1688_v58  ;;  %v1794_v61 = vadd.f32 %v1762_v30, %v1689_v56  ;;  %v1865_v60 = vmul.f32 %v2984_v49, %v1204_v52  ;;  %v1106_v25 = vld [vmem:[#allocation2 + $0xb0] sm:$0xff] }
 0x193   : > { %v1659_v6 = vmul.f32 %v2957_v12, %v1309_v37  ;;  %v1970_v0 = vmul.f32 %v2997_v19, %v1309_v37  ;;  %v1380_v40 = vadd.f32 %v1348_v51, %v1276_v14  ;;  %v1658_v31 = vmul.f32 %v2957_v12, %v1308_v50  ;;  %v1105_v14 = vld [vmem:[#allocation2 + $0xa8] sm:$0xff] }
 0x194   : > { %v1587_v26 = vadd.f32 %v1555_v63, %v1483_v15  ;;  %v1897_v8 = vadd.f32 %v1865_v60, %v1793_v22  ;;  %v1898_v39 = vadd.f32 %v1866_v33, %v1794_v61  ;;  %v1969_v5 = vmul.f32 %v2997_v19, %v1308_v50  ;;  %v1208_v30 = vld [vmem:[#allocation2 + $0xa9] sm:$0xff] }
 0x195   : > { %v1690_v23 = vadd.f32 %v1658_v31, %v1586_v36  ;;  %v1142_v53 = vmul.f32 %v2867_v16, %v1103_v48  ;;  %v1143_v3 = vmul.f32 %v2867_v16, %v1104_v1  ;;  %v1246_v4 = vmul.f32 %v2874_v13, %v1206_v7  ;;  %v1313_v36 = vld [vmem:[#allocation2 + $0xb2] sm:$0xff] }
 0x196   : > { %v2001_v54 = vadd.f32 %v1969_v5, %v1897_v8  ;;  %v2002_v2 = vadd.f32 %v1970_v0, %v1898_v39  ;;  %v1381_v52 = vadd.f32 %v1349_v29, %v1277_v41  ;;  %v1452_v20 = vmul.f32 %v2904_v57, %v1103_v48 }
 0x197   : > { %v1247_v43 = vmul.f32 %v2874_v13, %v1207_v18  ;;  %v1351_v24 = vmul.f32 %v2893_v11, %v1311_v35  ;;  %v1557_v27 = vmul.f32 %v2933_v44, %v1207_v18  ;;  %v1453_v37 = vmul.f32 %v2904_v57, %v1104_v1 }
 0x198   : > { %v1661_v10 = vmul.f32 %v2957_v12, %v1311_v35  ;;  %2033 = vst.msk [vmem:[%s3015_s22 + $0x30] sm:$0xff] %vm1002_vm0, %v2001_v54  ;;  %2034 = vst.msk [vmem:[%s3015_s22 + $0x38] sm:$0xff] %vm1002_vm0, %v2002_v2  ;;  %v1484_v34 = vadd.f32 %v1452_v20, %v1380_v40  ;;  %v1691_v21 = vadd.f32 %v1659_v6, %v1587_v26 }
 0x199   : > { %v1763_v32 = vmul.f32 %v2976_v28, %v1103_v48  ;;  %v1278_v9 = vadd.f32 %v1246_v4, %v1142_v53  ;;  %v1485_v17 = vadd.f32 %v1453_v37, %v1381_v52  ;;  %v1556_v58 = vmul.f32 %v2933_v44, %v1206_v7 }
 0x19a   : > { %v1764_v47 = vmul.f32 %v2976_v28, %v1104_v1  ;;  %v1868_v50 = vmul.f32 %v2984_v49, %v1207_v18  ;;  %v1279_v45 = vadd.f32 %v1247_v43, %v1143_v3  ;;  %v1867_v29 = vmul.f32 %v2984_v49, %v1206_v7  ;;  %v1312_v18 = vld [vmem:[#allocation2 + $0xaa] sm:$0xff] }
 0x19b   : > { %v1795_v42 = vadd.f32 %v1763_v32, %v1690_v23  ;;  %v1972_v62 = vmul.f32 %v2997_v19, %v1311_v35  ;;  %v1350_v56 = vmul.f32 %v2893_v11, %v1310_v59  ;;  %v1588_v46 = vadd.f32 %v1556_v58, %v1484_v34  ;;  %v1108_v34 = vld [vmem:[#allocation2 + $0xc8] sm:$0xff] }
 0x19c   : > { %v1796_v15 = vadd.f32 %v1764_v47, %v1691_v21  ;;  %v1249_v63 = vmul.f32 %v2874_v13, %v1209_v38  ;;  %v1589_v33 = vadd.f32 %v1557_v27, %v1485_v17  ;;  %v1971_v51 = vmul.f32 %v2997_v19, %v1310_v59  ;;  %v1210_v21 = vld [vmem:[#allocation2 + $0xc1] sm:$0xff]  ;;  %v886_v47 = vpop.permute.xlu1 %885 }
 0x19d   : > { %v1899_v41 = vadd.f32 %v1867_v29, %v1795_v42  ;;  %v1382_v22 = vadd.f32 %v1350_v56, %v1278_v9  ;;  %v1660_v61 = vmul.f32 %v2957_v12, %v1310_v59  ;;  %v1144_v48 = vmul.f32 %v2867_v16, %v1105_v14  ;;  %v1107_v59 = vld [vmem:[#allocation2 + $0xc0] sm:$0xff]  ;;  %v1745_v29 = vld [vmem:[#allocation2 + $0x198] sm:$0xff] }
 0x19e   : > { %v1900_v60 = vadd.f32 %v1868_v50, %v1796_v15  ;;  %v1145_v7 = vmul.f32 %v2867_v16, %v1106_v25  ;;  %v1248_v6 = vmul.f32 %v2874_v13, %v1208_v30  ;;  %v1383_v0 = vadd.f32 %v1351_v24, %v1279_v45 }
 0x19f   : > { %v2003_v1 = vadd.f32 %v1971_v51, %v1899_v41  ;;  %v1692_v40 = vadd.f32 %v1660_v61, %v1588_v46  ;;  %v1454_v35 = vmul.f32 %v2904_v57, %v1105_v14  ;;  %v1455_v26 = vmul.f32 %v2904_v57, %v1106_v25 }
 0x1a0   : > { %v2004_v31 = vadd.f32 %v1972_v62, %v1900_v60  ;;  %v1353_v8 = vmul.f32 %v2893_v11, %v1313_v36  ;;  %v1280_v39 = vadd.f32 %v1248_v6, %v1144_v48  ;;  %v1558_v5 = vmul.f32 %v2933_v44, %v1208_v30  ;;  %v1211_v62 = vld [vmem:[#allocation2 + $0xc9] sm:$0xff] }
 0x1a1   : > { %2035 = vst.msk [vmem:[%s3015_s22 + $0x40] sm:$0xff] %vm1002_vm0, %v2003_v1  ;;  %v1693_v23 = vadd.f32 %v1661_v10, %v1589_v33  ;;  %v1486_v53 = vadd.f32 %v1454_v35, %v1382_v22  ;;  %v1487_v3 = vadd.f32 %v1455_v26, %v1383_v0  ;;  %v1765_v4 = vmul.f32 %v2976_v28, %v1105_v14  ;;  %v1746_v14 = vld [vmem:[#allocation2 + $0x1a0] sm:$0xff]  ;;  %v1315_v6 = vld [vmem:[#allocation2 + $0xca] sm:$0xff]  ;;  %v3213_v35 = vpop.permute.xlu1 %893 }
 0x1a2   : > { %2036 = vst.msk [vmem:[%s3015_s22 + $0x48] sm:$0xff] %vm1002_vm0, %v2004_v31  ;;  %v1766_v54 = vmul.f32 %v2976_v28, %v1106_v25  ;;  %v1559_v2 = vmul.f32 %v2933_v44, %v1209_v38  ;;  %v1870_v52 = vmul.f32 %v2984_v49, %v1209_v38  ;;  %v1281_v20 = vadd.f32 %v1249_v63, %v1145_v7  ;;  %v1314_v60 = vld [vmem:[#allocation2 + $0xc2] sm:$0xff] }
 0x1a3   : > { %v1352_v43 = vmul.f32 %v2893_v11, %v1312_v18  ;;  %v1590_v24 = vadd.f32 %v1558_v5, %v1486_v53  ;;  %v1797_v27 = vadd.f32 %v1765_v4, %v1692_v40  ;;  %v1869_v10 = vmul.f32 %v2984_v49, %v1208_v30 }
 0x1a4   : > { %v1798_v37 = vadd.f32 %v1766_v54, %v1693_v23  ;;  %v1663_v32 = vmul.f32 %v2957_v12, %v1313_v36  ;;  %v1974_v9 = vmul.f32 %v2997_v19, %v1313_v36  ;;  %v1662_v58 = vmul.f32 %v2957_v12, %v1312_v18 }
 0x1a5   : > { %v1384_v17 = vadd.f32 %v1352_v43, %v1280_v39  ;;  %v1591_v38 = vadd.f32 %v1559_v2, %v1487_v3  ;;  %v1901_v50 = vadd.f32 %v1869_v10, %v1797_v27  ;;  %v1973_v42 = vmul.f32 %v2997_v19, %v1312_v18  ;;  %v1109_v43 = vld [vmem:[#allocation2 + $0xd8] sm:$0xff]  ;;  %v906_v27 = vpop.permute.xlu0 %905  ;;  %v1213_v10 = vld [vmem:[#allocation2 + $0xe1] sm:$0xff] }
 0x1a6   : > { %v1902_v45 = vadd.f32 %v1870_v52, %v1798_v37  ;;  %v1694_v56 = vadd.f32 %v1662_v58, %v1590_v24  ;;  %v1146_v46 = vmul.f32 %v2867_v16, %v1107_v59  ;;  %v1147_v15 = vmul.f32 %v2867_v16, %v1108_v34  ;;  %v1110_v24 = vld [vmem:[#allocation2 + $0xe0] sm:$0xff] }
 0x1a7   : > { %v1250_v25 = vmul.f32 %v2874_v13, %v1210_v21  ;;  %v2005_v30 = vadd.f32 %v1973_v42, %v1901_v50  ;;  %v1385_v33 = vadd.f32 %v1353_v8, %v1281_v20  ;;  %v1456_v41 = vmul.f32 %v2904_v57, %v1107_v59 }
 0x1a8   : > { %v2006_v63 = vadd.f32 %v1974_v9, %v1902_v45  ;;  %v1457_v51 = vmul.f32 %v2904_v57, %v1108_v34  ;;  %v3200_v36 = vmul.f32 %v2976_v28, %v1745_v29  ;;  %v3203_v22 = vmul.f32 %v2976_v28, %v1746_v14  ;;  %v3229_v14 = vpop.permute.xlu1 %901 }
 0x1a9   : > { %v1251_v61 = vmul.f32 %v2874_v13, %v1211_v62  ;;  %2037 = vst.msk [vmem:[%s3015_s22 + $0x50] sm:$0xff] %vm1002_vm0, %v2005_v30  ;;  %v1488_v48 = vadd.f32 %v1456_v41, %v1384_v17  ;;  %v1695_v1 = vadd.f32 %v1663_v32, %v1591_v38  ;;  %v1767_v7 = vmul.f32 %v2976_v28, %v1107_v59  ;;  %v1212_v32 = vld [vmem:[#allocation2 + $0xd9] sm:$0xff] }
 0x1aa   : > { %2038 = vst.msk [vmem:[%s3015_s22 + $0x58] sm:$0xff] %vm1002_vm0, %v2006_v63  ;;  %v1282_v0 = vadd.f32 %v1250_v25, %v1146_v46  ;;  %v1489_v40 = vadd.f32 %v1457_v51, %v1385_v33  ;;  %v1560_v31 = vmul.f32 %v2933_v44, %v1210_v21  ;;  %v1768_v18 = vmul.f32 %v2976_v28, %v1108_v34  ;;  %v1316_v25 = vld [vmem:[#allocation2 + $0xda] sm:$0xff] }
 0x1ab   : > { %v1561_v26 = vmul.f32 %v2933_v44, %v1211_v62  ;;  %v1283_v8 = vadd.f32 %v1251_v61, %v1147_v15  ;;  %v1799_v39 = vadd.f32 %v1767_v7, %v1694_v56  ;;  %v1871_v5 = vmul.f32 %v2984_v49, %v1210_v21  ;;  %v1319_v7 = vld [vmem:[#allocation2 + $0xfa] sm:$0xff] }
 0x1ac   : > { %v1872_v23 = vmul.f32 %v2984_v49, %v1211_v62  ;;  %v1354_v53 = vmul.f32 %v2893_v11, %v1314_v60  ;;  %v1592_v3 = vadd.f32 %v1560_v31, %v1488_v48  ;;  %v1800_v4 = vadd.f32 %v1768_v18, %v1695_v1  ;;  %v1215_v1 = vld [vmem:[#allocation2 + $0xf9] sm:$0xff] }
 0x1ad   : > { %v1355_v54 = vmul.f32 %v2893_v11, %v1315_v6  ;;  %v1593_v2 = vadd.f32 %v1561_v26, %v1489_v40  ;;  %v1903_v52 = vadd.f32 %v1871_v5, %v1799_v39  ;;  %v1975_v20 = vmul.f32 %v2997_v19, %v1314_v60 }
 0x1ae   : > { %v1976_v37 = vmul.f32 %v2997_v19, %v1315_v6  ;;  %v1386_v59 = vadd.f32 %v1354_v53, %v1282_v0  ;;  %v1664_v34 = vmul.f32 %v2957_v12, %v1314_v60  ;;  %v1904_v21 = vadd.f32 %v1872_v23, %v1800_v4 }
 0x1af   : > { %v1665_v9 = vmul.f32 %v2957_v12, %v1315_v6  ;;  %v2007_v17 = vadd.f32 %v1975_v20, %v1903_v52  ;;  %v1387_v58 = vadd.f32 %v1355_v54, %v1283_v8  ;;  %v3225_v38 = vmul.f32 %v2844_v55, %v886_v47  ;;  %v1317_v47 = vld [vmem:[#allocation2 + $0xe2] sm:$0xff]  ;;  %v1111_v20 = vld [vmem:[#allocation2 + $0xf0] sm:$0xff] }
 0x1b0   : > { %v1696_v50 = vadd.f32 %v1664_v34, %v1592_v3  ;;  %v2008_v45 = vadd.f32 %v1976_v37, %v1904_v21  ;;  %v1458_v42 = vmul.f32 %v2904_v57, %v1109_v43  ;;  %v1459_v29 = vmul.f32 %v2904_v57, %v1110_v24  ;;  %v3254_v3 = vpop.permute.xlu1 %909 }
 0x1b1   : > { %v1563_v62 = vmul.f32 %v2933_v44, %v1213_v10  ;;  %2039 = vst.msk [vmem:[%s3015_s22 + $0x60] sm:$0xff] %vm1002_vm0, %v2007_v17  ;;  %v1562_v56 = vmul.f32 %v2933_v44, %v1212_v32  ;;  %v1697_v46 = vadd.f32 %v1665_v9, %v1593_v2  ;;  %v3236_v15 = vmul.f32 %v2844_v55, %v906_v27  ;;  %v3246_v55 = vpop.permute.xlu0 %913  ;;  %v3275_v17 = vld [vmem:[#allocation2 + $0x111] sm:$0xff] }
 0x1b2   : > { %2040 = vst.msk [vmem:[%s3015_s22 + $0x68] sm:$0xff] %vm1002_vm0, %v2008_v45  ;;  %v1490_v30 = vadd.f32 %v1458_v42, %v1386_v59  ;;  %v1491_v63 = vadd.f32 %v1459_v29, %v1387_v58  ;;  %v1769_v33 = vmul.f32 %v2976_v28, %v1109_v43  ;;  %v1770_v41 = vmul.f32 %v2976_v28, %v1110_v24  ;;  %v1112_v59 = vld [vmem:[#allocation2 + $0xf8] sm:$0xff]  ;;  %v3288_v42 = vld [vmem:[%s3612_s2 + $0x1] ss:$0 sm:$0xff] }
 0x1b3   : > { %v1874_v51 = vmul.f32 %v2984_v49, %v1213_v10  ;;  %v1148_v61 = vmul.f32 %v2867_v16, %v1109_v43  ;;  %v1149_v60 = vmul.f32 %v2867_v16, %v1110_v24  ;;  %v1252_v48 = vmul.f32 %v2874_v13, %v1212_v32  ;;  %v1214_v43 = vld [vmem:[#allocation2 + $0xf1] sm:$0xff] }
 0x1b4   : > { %v1594_v6 = vadd.f32 %v1562_v56, %v1490_v30  ;;  %v1801_v0 = vadd.f32 %v1769_v33, %v1696_v50  ;;  %v1802_v40 = vadd.f32 %v1770_v41, %v1697_v46  ;;  %v1873_v31 = vmul.f32 %v2984_v49, %v1212_v32  ;;  %v3277_v58 = vld [vmem:[#allocation2 + $0x112] sm:$0xff]  ;;  %v3282_v50 = vld [vmem:[%s3612_s2] ss:$0 sm:$0xff] }
 0x1b5   : > { %v1253_v18 = vmul.f32 %v2874_v13, %v1213_v10  ;;  %v1357_v26 = vmul.f32 %v2893_v11, %v1317_v47  ;;  %v1978_v8 = vmul.f32 %v2997_v19, %v1317_v47  ;;  %v1666_v39 = vmul.f32 %v2957_v12, %v1316_v25  ;;  %v922_v9 = vpop.permute.xlu0 %921 }
 0x1b6   : > { %v1595_v16 = vadd.f32 %v1563_v62, %v1491_v63  ;;  %v1905_v5 = vadd.f32 %v1873_v31, %v1801_v0  ;;  %v1906_v23 = vadd.f32 %v1874_v51, %v1802_v40  ;;  %v1977_v53 = vmul.f32 %v2997_v19, %v1316_v25 }
 0x1b7   : > { %v1667_v4 = vmul.f32 %v2957_v12, %v1317_v47  ;;  %v3258_v54 = vmul.f32 %v2874_v13, %v1215_v1  ;;  %v3261_v2 = vmul.f32 %v2893_v11, %v1319_v7  ;;  %v1284_v52 = vadd.f32 %v1252_v48, %v1148_v61 }
 0x1b8   : > { %v1285_v24 = vadd.f32 %v1253_v18, %v1149_v60  ;;  %v1698_v27 = vadd.f32 %v1666_v39, %v1594_v6  ;;  %v2009_v37 = vadd.f32 %v1977_v53, %v1905_v5  ;;  %v2010_v10 = vadd.f32 %v1978_v8, %v1906_v23  ;;  %v918_v60 = vpop.permute.xlu1 %917  ;;  %v3654_v39 = vld [vmem:[#allocation17_spill] sm:$0xff] }
 0x1b9   : > { %v3264_v34 = vmul.f32 %v2933_v44, %v1215_v1  ;;  %v3267_v21 = vmul.f32 %v2957_v12, %v1319_v7  ;;  %v1876_v13 = vmul.f32 %v2984_v49, %v1215_v1  ;;  %v1356_v32 = vmul.f32 %v2893_v11, %v1316_v25  ;;  %v1318_v25 = vld [vmem:[#allocation2 + $0xf2] sm:$0xff]  ;;  %v930_v5 = vpop.permute.xlu0 %929 }
 0x1ba   : > { %2041 = vst.msk [vmem:[%s3015_s22 + $0x70] sm:$0xff] %vm1002_vm0, %v2009_v37  ;;  %2042 = vst.msk [vmem:[%s3015_s22 + $0x78] sm:$0xff] %vm1002_vm0, %v2010_v10  ;;  %v1150_v45 = vmul.f32 %v3282_v50, %v1111_v20  ;;  %v1254_v29 = vmul.f32 %v3288_v42, %v1214_v43  ;;  %v1699_v62 = vadd.f32 %v1667_v4, %v1595_v16  ;;  %v3655_v4 = vld [vmem:[#allocation21_spill] sm:$0xff] }
 0x1bb   : > { %v1771_v56 = vmul.f32 %v2976_v28, %v1111_v20  ;;  %v1980_v46 = vmul.f32 %v2997_v19, %v1319_v7  ;;  %v1388_v47 = vadd.f32 %v1356_v32, %v1284_v52  ;;  %v1460_v30 = vmul.f32 %v2904_v57, %v1111_v20  ;;  %v2175_v20 = vld [vmem:[%s3611_s1 + $0x3] ss:$0 sm:$0xff] }
 0x1bc   : > { %v1772_v63 = vmul.f32 %v2976_v28, %v1112_v59  ;;  %v1389_v33 = vadd.f32 %v1357_v26, %v1285_v24  ;;  %v1461_v41 = vmul.f32 %v2904_v57, %v1112_v59  ;;  %v1875_v61 = vmul.f32 %v2984_v49, %v1214_v43  ;;  %v3309_v57 = vld [vmem:[%s3612_s2 + $0x2] ss:$0 sm:$0xff]  ;;  %v926_v32 = vpop.permute.xlu1 %925 }
 0x1bd   : > { %v1803_v51 = vadd.f32 %v1771_v56, %v1698_v27  ;;  %v3299_v48 = vmul.f32 %v3288_v42, %v3275_v17  ;;  %v3303_v1 = vmul.f32 %v2893_v11, %v3277_v58  ;;  %v1151_v7 = vmul.f32 %v3282_v50, %v1112_v59 }
 0x1be   : > { %v1804_v6 = vadd.f32 %v1772_v63, %v1699_v62  ;;  %v1286_v0 = vadd.f32 %v1254_v29, %v1150_v45  ;;  %v1358_v40 = vmul.f32 %v3309_v57, %v1318_v25  ;;  %v1979_v18 = vmul.f32 %v2997_v19, %v1318_v25  ;;  %v3657_v45 = vld [vmem:[#allocation3_spill] sm:$0xff]  ;;  %v3661_v63 = vld [vmem:[#allocation4_spill] sm:$0xff] }
 0x1bf   : > { %v1907_v31 = vadd.f32 %v1875_v61, %v1803_v51  ;;  %v1492_v26 = vadd.f32 %v1460_v30, %v1388_v47  ;;  %v1564_v8 = vmul.f32 %v2933_v44, %v1214_v43  ;;  %v990_v16 = vadd.f32 %v3225_v38, %v3654_v39  ;;  %v3658_v29 = vld [vmem:[#allocation19_spill] sm:$0xff]  ;;  %v3660_v30 = vld [vmem:[#allocation20_spill] sm:$0xff] }
 0x1c0   : > { %v1908_v11 = vadd.f32 %v1876_v13, %v1804_v6  ;;  %v1493_v23 = vadd.f32 %v1461_v41, %v1389_v33  ;;  %v995_v52 = vadd.f32 %v3236_v15, %v3655_v4  ;;  %v960_v24 = vmul.f32 %v2175_v20, %v3213_v35  ;;  %v3656_v15 = vld [vmem:[#allocation18_spill] sm:$0xff] }
 0x1c1   : > { %v2011_v53 = vadd.f32 %v1979_v18, %v1907_v31  ;;  %1079 = vst.msk [vmem:[#allocation2 + $0x109] sm:$0xff] %vm1002_vm0, %v990_v16  ;;  %v965_v44 = vmul.f32 %v2175_v20, %v3246_v55  ;;  %v962_v38 = vmul.f32 %v2175_v20, %v3229_v14  ;;  %v967_v43 = vmul.f32 %v2175_v20, %v922_v9  ;;  %v3659_v9 = vld [vmem:[#allocation10_spill] sm:$0xff] }
 0x1c2   : > { %v2012_v27 = vadd.f32 %v1980_v46, %v1908_v11  ;;  %1084 = vst.msk [vmem:[#allocation2 + $0x141] sm:$0xff] %vm1002_vm0, %v995_v52  ;;  %v992_v37 = vadd.f32 %v960_v24, %v3656_v15  ;;  %v964_v10 = vmul.f32 %v2175_v20, %v3254_v3  ;;  %v969_v59 = vmul.f32 %v2175_v20, %v930_v5  ;;  %v1219_v46 = vld [vmem:[#allocation2 + $0x129] sm:$0xff] }
 0x1c3   : > { %2043 = vst.msk [vmem:[%s3015_s22 + $0x80] sm:$0xff] %vm1002_vm0, %v2011_v53  ;;  %v966_v13 = vmul.f32 %v2175_v20, %v918_v60  ;;  %v1287_v35 = vadd.f32 %v3258_v54, %v1151_v7  ;;  %v997_v55 = vadd.f32 %v965_v44, %v3657_v45  ;;  %v994_v14 = vadd.f32 %v962_v38, %v3658_v29  ;;  %v1323_v47 = vld [vmem:[#allocation2 + $0x12a] sm:$0xff]  ;;  %v3343_v54 = vld [vmem:[%s3612_s2 + $0x4] ss:$0 sm:$0xff] }
 0x1c4   : > { %2044 = vst.msk [vmem:[%s3015_s22 + $0x88] sm:$0xff] %vm1002_vm0, %v2012_v27  ;;  %v999_v62 = vadd.f32 %v967_v43, %v3659_v9  ;;  %v1596_v56 = vadd.f32 %v1564_v8, %v1492_v26  ;;  %1081 = vst.msk [vmem:[#allocation2 + $0x121] sm:$0xff] %vm1002_vm0, %v992_v37  ;;  %v996_v3 = vadd.f32 %v964_v10, %v3660_v30  ;;  %v3662_v41 = vld [vmem:[#allocation22_spill] sm:$0xff] }
 0x1c5   : > { %v1001_v33 = vadd.f32 %v969_v59, %v3661_v63  ;;  %v998_v51 = vadd.f32 %v966_v13, %v3662_v41  ;;  %v1567_v61 = vmul.f32 %v3343_v54, %v3275_v17  ;;  %v3349_v60 = vmul.f32 %v2957_v12, %v3277_v58  ;;  %1086 = vst.msk [vmem:[#allocation2 + $0x159] sm:$0xff] %vm1002_vm0, %v997_v55 }
 0x1c6   : > { %v1878_v7 = vmul.f32 %v2984_v49, %v3275_v17  ;;  %1083 = vst.msk [vmem:[#allocation2 + $0x139] sm:$0xff] %vm1002_vm0, %v994_v14  ;;  %1088 = vst.msk [vmem:[#allocation2 + $0x171] sm:$0xff] %vm1002_vm0, %v999_v62  ;;  %v968_v6 = vmul.f32 %v2175_v20, %v926_v32  ;;  %v3358_v31 = vmul.f32 %v2997_v19, %v3277_v58 }
 0x1c7   : > { %v1390_v18 = vadd.f32 %v1358_v40, %v1286_v0  ;;  %v1597_v26 = vadd.f32 %v3264_v34, %v1493_v23  ;;  %v1668_v8 = vmul.f32 %v2957_v12, %v1318_v25  ;;  %1085 = vst.msk [vmem:[#allocation2 + $0x151] sm:$0xff] %vm1002_vm0, %v996_v3  ;;  %1090 = vst.msk [vmem:[#allocation2 + $0x189] sm:$0xff] %vm1002_vm0, %v1001_v33  ;;  %v3663_v0 = vld [vmem:[#allocation23_spill] sm:$0xff] }
 0x1c8   : > { %1087 = vst.msk [vmem:[#allocation2 + $0x169] sm:$0xff] %vm1002_vm0, %v998_v51  ;;  %v3366_v17 = vmul.f32 %v3288_v42, %v1219_v46  ;;  %v3369_v11 = vmul.f32 %v3309_v57, %v1323_v47  ;;  %v3372_v58 = vmul.f32 %v3343_v54, %v1219_v46  ;;  %v1000_v40 = vadd.f32 %v968_v6, %v3663_v0  ;;  %v1113_v16 = vld [vmem:[#allocation2 + $0x108] sm:$0xff]  ;;  %v1114_v5 = vld [vmem:[#allocation2 + $0x110] sm:$0xff] }
 0x1c9   : > { %v1700_v34 = vadd.f32 %v1668_v8, %v1596_v56  ;;  %v3376_v25 = vmul.f32 %v2957_v12, %v1323_v47  ;;  %v3379_v39 = vmul.f32 %v2984_v49, %v1219_v46  ;;  %v1216_v23 = vld [vmem:[#allocation2 + $0x109] sm:$0xff]  ;;  %v1391_v53 = vadd.f32 %v3261_v2, %v1287_v35  ;;  %v3388_v12 = vld [vmem:[%s3612_s2 + $0x3] ss:$0 sm:$0xff]  ;;  %v3404_v35 = vld [vmem:[%s3612_s2 + $0x5] ss:$0 sm:$0xff] }
 0x1ca   : > { %v1152_v4 = vmul.f32 %v3282_v50, %v1113_v16  ;;  %v1153_v52 = vmul.f32 %v3282_v50, %v1114_v5  ;;  %v1256_v20 = vmul.f32 %v3288_v42, %v1216_v23  ;;  %v1320_v24 = vld [vmem:[#allocation2 + $0x10a] sm:$0xff]  ;;  %v1462_v49 = vmul.f32 %v3388_v12, %v1113_v16  ;;  %1089 = vst.msk [vmem:[#allocation2 + $0x181] sm:$0xff] %vm1002_vm0, %v1000_v40  ;;  %v1221_v59 = vld [vmem:[#allocation2 + $0x141] sm:$0xff] }
 0x1cb   : > { %v3393_v27 = vmul.f32 %v2997_v19, %v1323_v47  ;;  %v1360_v2 = vmul.f32 %v3309_v57, %v1320_v24  ;;  %v1463_v44 = vmul.f32 %v3388_v12, %v1114_v5  ;;  %v1701_v38 = vadd.f32 %v3267_v21, %v1597_v26  ;;  %v3410_v21 = vld [vmem:[%s3612_s2 + $0x6] ss:$0 sm:$0xff]  ;;  %v1116_v63 = vld [vmem:[#allocation2 + $0x128] sm:$0xff] }
 0x1cc   : > { %v1288_v43 = vadd.f32 %v1256_v20, %v1152_v4  ;;  %v1494_v15 = vadd.f32 %v1462_v49, %v1390_v18  ;;  %v1566_v37 = vmul.f32 %v3343_v54, %v1216_v23  ;;  %v1773_v10 = vmul.f32 %v2976_v28, %v1113_v16  ;;  %v1325_v29 = vld [vmem:[#allocation2 + $0x142] sm:$0xff] }
 0x1cd   : > { %v1289_v13 = vadd.f32 %v3299_v48, %v1153_v52  ;;  %v1495_v32 = vadd.f32 %v1463_v44, %v1391_v53  ;;  %v1670_v45 = vmul.f32 %v3404_v35, %v1320_v24  ;;  %v1774_v55 = vmul.f32 %v3410_v21, %v1114_v5  ;;  %v3416_v48 = vld [vmem:[%s3612_s2 + $0x7] ss:$0 sm:$0xff] }
 0x1ce   : > { %v1598_v28 = vadd.f32 %v1566_v37, %v1494_v15  ;;  %v1805_v14 = vadd.f32 %v1773_v10, %v1700_v34  ;;  %v1877_v9 = vmul.f32 %v3416_v48, %v1216_v23  ;;  %v1981_v62 = vmul.f32 %v2997_v19, %v1320_v24  ;;  %v1115_v56 = vld [vmem:[#allocation2 + $0x120] sm:$0xff] }
 0x1cf   : > { %v1392_v46 = vadd.f32 %v1360_v2, %v1288_v43  ;;  %v1599_v47 = vadd.f32 %v1567_v61, %v1495_v32  ;;  %v1806_v30 = vadd.f32 %v1774_v55, %v1701_v38  ;;  %v3421_v3 = vmul.f32 %v3288_v42, %v1221_v59  ;;  %v1218_v33 = vld [vmem:[#allocation2 + $0x121] sm:$0xff]  ;;  %v1223_v43 = vld [vmem:[#allocation2 + $0x159] sm:$0xff] }
 0x1d0   : > { %v1702_v41 = vadd.f32 %v1670_v45, %v1598_v28  ;;  %v1909_v51 = vadd.f32 %v1877_v9, %v1805_v14  ;;  %v3424_v6 = vmul.f32 %v3309_v57, %v1325_v29  ;;  %v3427_v18 = vmul.f32 %v3343_v54, %v1221_v59  ;;  %v1322_v0 = vld [vmem:[#allocation2 + $0x122] sm:$0xff]  ;;  %v1327_v15 = vld [vmem:[#allocation2 + $0x15a] sm:$0xff] }
 0x1d1   : > { %v1910_v26 = vadd.f32 %v1878_v7, %v1806_v30  ;;  %v3430_v19 = vmul.f32 %v3404_v35, %v1325_v29  ;;  %v3433_v61 = vmul.f32 %v3416_v48, %v1221_v59  ;;  %v1154_v8 = vmul.f32 %v3282_v50, %v1115_v56  ;;  %v3443_v7 = vld [vmem:[%s3612_s2 + $0x8] ss:$0 sm:$0xff]  ;;  %v1118_v28 = vld [vmem:[#allocation2 + $0x140] sm:$0xff] }
 0x1d2   : > { %v2013_v40 = vadd.f32 %v1981_v62, %v1909_v51  ;;  %v1155_v34 = vmul.f32 %v3282_v50, %v1116_v63  ;;  %v1258_v16 = vmul.f32 %v3288_v42, %v1218_v33  ;;  %v1393_v5 = vadd.f32 %v3303_v1, %v1289_v13  ;;  %v1220_v14 = vld [vmem:[#allocation2 + $0x139] sm:$0xff] }
 0x1d3   : > { %v2014_v23 = vadd.f32 %v3358_v31, %v1910_v26  ;;  %v3446_v53 = vmul.f32 %v3443_v7, %v1325_v29  ;;  %v1464_v4 = vmul.f32 %v3388_v12, %v1115_v56  ;;  %v1465_v52 = vmul.f32 %v3388_v12, %v1116_v63  ;;  %v1117_v29 = vld [vmem:[#allocation2 + $0x138] sm:$0xff] }
 0x1d4   : > { %2045 = vst.msk [vmem:[%s3015_s22 + $0x90] sm:$0xff] %vm1002_vm0, %v2013_v40  ;;  %v1290_v20 = vadd.f32 %v1258_v16, %v1154_v8  ;;  %v1362_v24 = vmul.f32 %v3309_v57, %v1322_v0  ;;  %v1568_v1 = vmul.f32 %v3343_v54, %v1218_v33  ;;  %v1703_v31 = vadd.f32 %v3349_v60, %v1599_v47 }
 0x1d5   : > { %2046 = vst.msk [vmem:[%s3015_s22 + $0x98] sm:$0xff] %vm1002_vm0, %v2014_v23  ;;  %v1496_v49 = vadd.f32 %v1464_v4, %v1392_v46  ;;  %v1497_v2 = vadd.f32 %v1465_v52, %v1393_v5  ;;  %v1775_v44 = vmul.f32 %v3410_v21, %v1115_v56  ;;  %v1776_v38 = vmul.f32 %v3410_v21, %v1116_v63 }
 0x1d6   : > { %v1291_v37 = vadd.f32 %v3366_v17, %v1155_v34  ;;  %v1394_v10 = vadd.f32 %v1362_v24, %v1290_v20  ;;  %v1672_v59 = vmul.f32 %v3404_v35, %v1322_v0  ;;  %v1879_v13 = vmul.f32 %v3416_v48, %v1218_v33  ;;  %v1225_v20 = vld [vmem:[#allocation2 + $0x171] sm:$0xff] }
 0x1d7   : > { %v1600_v32 = vadd.f32 %v1568_v1, %v1496_v49  ;;  %v1807_v45 = vadd.f32 %v1775_v44, %v1702_v41  ;;  %v1808_v60 = vadd.f32 %v1776_v38, %v1703_v31  ;;  %v1983_v55 = vmul.f32 %v3443_v7, %v1322_v0 }
 0x1d8   : > { %v1601_v9 = vadd.f32 %v3372_v58, %v1497_v2  ;;  %v3465_v62 = vmul.f32 %v3288_v42, %v1223_v43  ;;  %v3468_v17 = vmul.f32 %v3309_v57, %v1327_v15  ;;  %v3471_v56 = vmul.f32 %v3343_v54, %v1223_v43  ;;  %v1324_v58 = vld [vmem:[#allocation2 + $0x13a] sm:$0xff]  ;;  %v1329_v2 = vld [vmem:[#allocation2 + $0x172] sm:$0xff] }
 0x1d9   : > { %v1911_v46 = vadd.f32 %v1879_v13, %v1807_v45  ;;  %v1912_v47 = vadd.f32 %v3379_v39, %v1808_v60  ;;  %v3475_v30 = vmul.f32 %v3404_v35, %v1327_v15  ;;  %v3478_v63 = vmul.f32 %v3416_v48, %v1223_v43 }
 0x1da   : > { %v1704_v33 = vadd.f32 %v1672_v59, %v1600_v32  ;;  %v1156_v41 = vmul.f32 %v3282_v50, %v1117_v29  ;;  %v1157_v51 = vmul.f32 %v3282_v50, %v1118_v28  ;;  %v1260_v26 = vmul.f32 %v3288_v42, %v1220_v14  ;;  %v1222_v32 = vld [vmem:[#allocation2 + $0x151] sm:$0xff] }
 0x1db   : > { %v2015_v8 = vadd.f32 %v1983_v55, %v1911_v46  ;;  %v2016_v0 = vadd.f32 %v3393_v27, %v1912_v47  ;;  %v1395_v39 = vadd.f32 %v3369_v11, %v1291_v37  ;;  %v1466_v40 = vmul.f32 %v3388_v12, %v1117_v29  ;;  %v1119_v37 = vld [vmem:[#allocation2 + $0x150] sm:$0xff] }
 0x1dc   : > { %v3487_v34 = vmul.f32 %v3443_v7, %v1327_v15  ;;  %v1292_v16 = vadd.f32 %v1260_v26, %v1156_v41  ;;  %v1364_v5 = vmul.f32 %v3309_v57, %v1324_v58  ;;  %v1467_v23 = vmul.f32 %v3388_v12, %v1118_v28  ;;  %v1326_v46 = vld [vmem:[#allocation2 + $0x152] sm:$0xff] }
 0x1dd   : > { %2047 = vst.msk [vmem:[%s3015_s22 + $0xa0] sm:$0xff] %vm1002_vm0, %v2015_v8  ;;  %2048 = vst.msk [vmem:[%s3015_s22 + $0xa8] sm:$0xff] %vm1002_vm0, %v2016_v0  ;;  %v1498_v4 = vadd.f32 %v1466_v40, %v1394_v10  ;;  %v1570_v52 = vmul.f32 %v3343_v54, %v1220_v14  ;;  %v1705_v27 = vadd.f32 %v3376_v25, %v1601_v9 }
 0x1de   : > { %v1777_v11 = vmul.f32 %v3410_v21, %v1117_v29  ;;  %v1293_v24 = vadd.f32 %v3421_v3, %v1157_v51  ;;  %v1499_v1 = vadd.f32 %v1467_v23, %v1395_v39  ;;  %v1674_v31 = vmul.f32 %v3404_v35, %v1324_v58  ;;  %v1120_v3 = vld [vmem:[#allocation2 + $0x158] sm:$0xff] }
 0x1df   : > { %v1778_v49 = vmul.f32 %v3410_v21, %v1118_v28  ;;  %v1396_v44 = vadd.f32 %v1364_v5, %v1292_v16  ;;  %v1602_v38 = vadd.f32 %v1570_v52, %v1498_v4  ;;  %v1881_v15 = vmul.f32 %v3416_v48, %v1220_v14  ;;  %v1537_v4 = vld [vmem:[#allocation2 + $0x189] sm:$0xff] }
 0x1e0   : > { %v1809_v43 = vadd.f32 %v1777_v11, %v1704_v33  ;;  %v1603_v10 = vadd.f32 %v3427_v18, %v1499_v1  ;;  %v1985_v59 = vmul.f32 %v3443_v7, %v1324_v58  ;;  %v1265_v13 = vmul.f32 %v3288_v42, %v1225_v20  ;;  %v3537_v52 = vld [vmem:[#allocation2 + $0x18a] sm:$0xff] }
 0x1e1   : > { %v1810_v25 = vadd.f32 %v1778_v49, %v1705_v27  ;;  %v1706_v45 = vadd.f32 %v1674_v31, %v1602_v38  ;;  %v3506_v55 = vmul.f32 %v3309_v57, %v1329_v2  ;;  %v3509_v29 = vmul.f32 %v3343_v54, %v1225_v20  ;;  %v1121_v27 = vld [vmem:[#allocation2 + $0x168] sm:$0xff] }
 0x1e2   : > { %v1913_v60 = vadd.f32 %v1881_v15, %v1809_v43  ;;  %v3513_v18 = vmul.f32 %v3404_v35, %v1329_v2  ;;  %v3516_v14 = vmul.f32 %v3416_v48, %v1225_v20  ;;  %v1158_v9 = vmul.f32 %v3282_v50, %v1119_v37  ;;  %v1224_v38 = vld [vmem:[#allocation2 + $0x169] sm:$0xff] }
 0x1e3   : > { %v1914_v28 = vadd.f32 %v3433_v61, %v1810_v25  ;;  %v1159_v58 = vmul.f32 %v3282_v50, %v1120_v3  ;;  %v1262_v33 = vmul.f32 %v3288_v42, %v1222_v32  ;;  %v1397_v41 = vadd.f32 %v3424_v6, %v1293_v24 }
 0x1e4   : > { %v2017_v47 = vadd.f32 %v1985_v59, %v1913_v60  ;;  %v3524_v61 = vmul.f32 %v3443_v7, %v1329_v2  ;;  %v1468_v26 = vmul.f32 %v3388_v12, %v1119_v37  ;;  %v1469_v8 = vmul.f32 %v3388_v12, %v1120_v3 }
 0x1e5   : > { %v2018_v51 = vadd.f32 %v3446_v53, %v1914_v28  ;;  %v1294_v0 = vadd.f32 %v1262_v33, %v1158_v9  ;;  %v1366_v39 = vmul.f32 %v3309_v57, %v1326_v46  ;;  %v1572_v40 = vmul.f32 %v3343_v54, %v1222_v32 }
 0x1e6   : > { %2049 = vst.msk [vmem:[%s3015_s22 + $0xb0] sm:$0xff] %vm1002_vm0, %v2017_v47  ;;  %v1707_v16 = vadd.f32 %v3430_v19, %v1603_v10  ;;  %v1500_v6 = vadd.f32 %v1468_v26, %v1396_v44  ;;  %v1501_v53 = vadd.f32 %v1469_v8, %v1397_v41  ;;  %v1779_v5 = vmul.f32 %v3410_v21, %v1119_v37  ;;  %v1122_v19 = vld [vmem:[#allocation2 + $0x170] sm:$0xff]  ;;  %v1433_v26 = vld [vmem:[#allocation2 + $0x188] sm:$0xff] }
 0x1e7   : > { %2050 = vst.msk [vmem:[%s3015_s22 + $0xb8] sm:$0xff] %vm1002_vm0, %v2018_v51  ;;  %v1780_v23 = vmul.f32 %v3410_v21, %v1120_v3  ;;  %v1295_v11 = vadd.f32 %v3465_v62, %v1159_v58  ;;  %v1398_v20 = vadd.f32 %v1366_v39, %v1294_v0  ;;  %v1676_v24 = vmul.f32 %v3404_v35, %v1326_v46 }
 0x1e8   : > { %v1883_v1 = vmul.f32 %v3416_v48, %v1222_v32  ;;  %v1604_v31 = vadd.f32 %v1572_v40, %v1500_v6  ;;  %v1811_v49 = vadd.f32 %v1779_v5, %v1706_v45  ;;  %v1987_v44 = vmul.f32 %v3443_v7, %v1326_v46  ;;  %v1328_v32 = vld [vmem:[#allocation2 + $0x16a] sm:$0xff]  ;;  %v1536_v40 = vld [vmem:[#allocation2 + $0x181] sm:$0xff] }
 0x1e9   : > { %v1812_v2 = vadd.f32 %v1780_v23, %v1707_v16  ;;  %v1605_v43 = vadd.f32 %v3471_v56, %v1501_v53  ;;  %v1577_v15 = vmul.f32 %v3343_v54, %v1537_v4  ;;  %v3547_v37 = vmul.f32 %v3404_v35, %v3537_v52 }
 0x1ea   : > { %v1160_v62 = vmul.f32 %v3282_v50, %v1121_v27  ;;  %v1915_v10 = vadd.f32 %v1883_v1, %v1811_v49  ;;  %v3552_v59 = vmul.f32 %v3416_v48, %v1537_v4  ;;  %v1161_v3 = vmul.f32 %v3282_v50, %v1122_v19 }
 0x1eb   : > { %v1916_v25 = vadd.f32 %v3478_v63, %v1812_v2  ;;  %v1708_v56 = vadd.f32 %v1676_v24, %v1604_v31  ;;  %v1264_v45 = vmul.f32 %v3288_v42, %v1224_v38  ;;  %v1399_v60 = vadd.f32 %v3468_v17, %v1295_v11  ;;  %v1640_v11 = vld [vmem:[#allocation2 + $0x182] sm:$0xff] }
 0x1ec   : > { %v1470_v28 = vmul.f32 %v3388_v12, %v1121_v27  ;;  %v2019_v9 = vadd.f32 %v1987_v44, %v1915_v10  ;;  %v1297_v47 = vadd.f32 %v1265_v13, %v1161_v3  ;;  %v1471_v63 = vmul.f32 %v3388_v12, %v1122_v19  ;;  %v1432_v13 = vld [vmem:[#allocation2 + $0x180] sm:$0xff] }
 0x1ed   : > { %v2020_v46 = vadd.f32 %v3487_v34, %v1916_v25  ;;  %v1296_v58 = vadd.f32 %v1264_v45, %v1160_v62  ;;  %v1368_v33 = vmul.f32 %v3309_v57, %v1328_v32  ;;  %v1574_v50 = vmul.f32 %v3343_v54, %v1224_v38  ;;  %v1850_v31 = vld [vmem:[#allocation2 + $0x1a1] sm:$0xff] }
 0x1ee   : > { %v1502_v41 = vadd.f32 %v1470_v28, %v1398_v20  ;;  %2051 = vst.msk [vmem:[%s3015_s22 + $0xc0] sm:$0xff] %vm1002_vm0, %v2019_v9  ;;  %v1503_v42 = vadd.f32 %v1471_v63, %v1399_v60  ;;  %v1709_v17 = vadd.f32 %v3475_v30, %v1605_v43  ;;  %v1781_v51 = vmul.f32 %v3410_v21, %v1121_v27  ;;  %v1954_v62 = vld [vmem:[#allocation2 + $0x1a2] sm:$0xff] }
 0x1ef   : > { %2052 = vst.msk [vmem:[%s3015_s22 + $0xc8] sm:$0xff] %vm1002_vm0, %v2020_v46  ;;  %v1782_v34 = vmul.f32 %v3410_v21, %v1122_v19  ;;  %v1400_v8 = vadd.f32 %v1368_v33, %v1296_v58  ;;  %v1678_v57 = vmul.f32 %v3404_v35, %v1328_v32  ;;  %v1885_v39 = vmul.f32 %v3416_v48, %v1224_v38 }
 0x1f0   : > { %v1606_v0 = vadd.f32 %v1574_v50, %v1502_v41  ;;  %v1607_v16 = vadd.f32 %v3509_v29, %v1503_v42  ;;  %v1813_v6 = vadd.f32 %v1781_v51, %v1708_v56  ;;  %v1401_v5 = vadd.f32 %v3506_v55, %v1297_v47  ;;  %v1849_v29 = vld [vmem:[#allocation2 + $0x199] sm:$0xff] }
 0x1f1   : > { %v1814_v53 = vadd.f32 %v1782_v34, %v1709_v17  ;;  %v1989_v23 = vmul.f32 %v3443_v7, %v1328_v32  ;;  %v1472_v4 = vmul.f32 %v3388_v12, %v1432_v13  ;;  %v1473_v27 = vmul.f32 %v3388_v12, %v1433_v26 }
 0x1f2   : > { %v1710_v30 = vadd.f32 %v1678_v57, %v1606_v0  ;;  %v1917_v20 = vadd.f32 %v1885_v39, %v1813_v6  ;;  %v1576_v1 = vmul.f32 %v3343_v54, %v1536_v40  ;;  %v1711_v19 = vadd.f32 %v3513_v18, %v1607_v16  ;;  %v1953_v54 = vld [vmem:[#allocation2 + $0x19a] sm:$0xff] }
 0x1f3   : > { %v1918_v24 = vadd.f32 %v3516_v14, %v1814_v53  ;;  %v1504_v49 = vadd.f32 %v1472_v4, %v1400_v8  ;;  %v1505_v55 = vadd.f32 %v1473_v27, %v1401_v5  ;;  %v1783_v2 = vmul.f32 %v3410_v21, %v1432_v13 }
 0x1f4   : > { %v1784_v44 = vmul.f32 %v3410_v21, %v1433_v26  ;;  %v2021_v38 = vadd.f32 %v1989_v23, %v1917_v20  ;;  %v1680_v43 = vmul.f32 %v3404_v35, %v1640_v11  ;;  %v1887_v14 = vmul.f32 %v3416_v48, %v1536_v40 }
 0x1f5   : > { %v2022_v12 = vadd.f32 %v3524_v61, %v1918_v24  ;;  %v1608_v18 = vadd.f32 %v1576_v1, %v1504_v49  ;;  %v1609_v10 = vadd.f32 %v1577_v15, %v1505_v55  ;;  %v1815_v25 = vadd.f32 %v1783_v2, %v1710_v30 }
 0x1f6   : > { %v1816_v3 = vadd.f32 %v1784_v44, %v1711_v19  ;;  %v1992_v32 = vmul.f32 %v3443_v7, %v3537_v52  ;;  %2053 = vst.msk [vmem:[%s3015_s22 + $0xd0] sm:$0xff] %vm1002_vm0, %v2021_v38  ;;  %v1889_v21 = vmul.f32 %v3416_v48, %v1849_v29  ;;  %v1890_v35 = vmul.f32 %v3416_v48, %v1850_v31 }
 0x1f7   : > { %2054 = vst.msk [vmem:[%s3015_s22 + $0xd8] sm:$0xff] %vm1002_vm0, %v2022_v12  ;;  %v1991_v61 = vmul.f32 %v3443_v7, %v1640_v11  ;;  %v1712_v56 = vadd.f32 %v1680_v43, %v1608_v18  ;;  %v1713_v15 = vadd.f32 %v3547_v37, %v1609_v10  ;;  %v1919_v45 = vadd.f32 %v1887_v14, %v1815_v25 }
 0x1f8   : > { %v1920_v52 = vadd.f32 %v3552_v59, %v1816_v3  ;;  %v1993_v60 = vmul.f32 %v3443_v7, %v1953_v54  ;;  %v1994_v28 = vmul.f32 %v3443_v7, %v1954_v62 }
 0x1f9   : > { %v1817_v9 = vadd.f32 %v3200_v36, %v1712_v56  ;;  %v1818_v46 = vadd.f32 %v3203_v22, %v1713_v15  ;;  %v2023_v47 = vadd.f32 %v1991_v61, %v1919_v45 }
 0x1fa   : > { %v2024_v48 = vadd.f32 %v1992_v32, %v1920_v52 }
 0x1fb   : > { %v1921_v63 = vadd.f32 %v1889_v21, %v1817_v9  ;;  %v1922_v58 = vadd.f32 %v1890_v35, %v1818_v46  ;;  %2055 = vst.msk [vmem:[%s3015_s22 + $0xe0] sm:$0xff] %vm1002_vm0, %v2023_v47 }
 0x1fc   : > { %2056 = vst.msk [vmem:[%s3015_s22 + $0xe8] sm:$0xff] %vm1002_vm0, %v2024_v48 }
 0x1fd   : > { %v2025_v37 = vadd.f32 %v1993_v60, %v1921_v63  ;;  %v2026_v33 = vadd.f32 %v1994_v28, %v1922_v58 }
 0x1ff   : > { %2057 = vst.msk [vmem:[%s3015_s22 + $0xf0] sm:$0xff] %vm1002_vm0, %v2025_v37  ;;  %2058 = vst.msk [vmem:[%s3015_s22 + $0xf8] sm:$0xff] %vm1002_vm0, %v2026_v33 }
 0x200 PF: > { %s13_s12 = sadd.s32 1, %s2188_s12  }
 0x201   : > { %p10_p4 = scmp.ge.s32.totalorder %s13_s12, 4  }
 0x203   :  { %12 = sbr.rel (!%p10_p4) target bundleno = 1 (0x1), region = 75 }

</bundles_post_ra>
